<compile_context>
chip_gen: v5e
topology: v5e:2x2
jax: 0.10.0
libtpu: 0.0.40
codegen_flags: <defaults>
</compile_context>

<pallas_src>
import functools
import math

import jax
import jax.numpy as jnp
from jax.experimental import pallas as pl
from jax.experimental.pallas import tpu as pltpu

# ---------------- small Camembert-like config ----------------
VOCAB = 64
HIDDEN = 32
N_LAYERS = 2
N_HEADS = 2
HEAD_DIM = HIDDEN // N_HEADS
INTER = 64
MAX_POS = 32
PAD_ID = 1          # Camembert pad_token_id = 1 (RoBERTa convention)
LN_EPS = 1e-12


# ---------------- fused encoder kernel ----------------
def _layernorm(x, g, b, eps):
    mu = jnp.mean(x, axis=-1, keepdims=True)
    var = jnp.mean((x - mu) ** 2, axis=-1, keepdims=True)
    return (x - mu) * jax.lax.rsqrt(var + eps) * g + b


def _encoder_kernel(emb_ref, mask_ref, emb_g_ref, emb_b_ref,
                    wqkv_ref, bqkv_ref, wo_ref, bo_ref,
                    ln1g_ref, ln1b_ref,
                    wi_ref, bi_ref, wf_ref, bf_ref,
                    ln2g_ref, ln2b_ref,
                    o_ref, *, n_layers, n_heads, head_dim, hidden,
                    batch, seq, scale, eps):
    """Whole-encoder fused kernel.

    Activations stay in vregs/VMEM for the whole forward pass; the only HBM
    write is the final last_hidden_state.  Layer and head loops are short
    static Python loops (unrolled at trace time).
    """
    # Embedding LayerNorm (word+pos+type sum is computed in XLA and passed in).
    x = _layernorm(emb_ref[...], emb_g_ref[...], emb_b_ref[...], eps)   # (BS, H)
    mask = mask_ref[...]                                                # (B, 1, S)

    for l in range(n_layers):
        # ---- fused QKV projection: one (BS,H) x (H,3H) MXU matmul ----
        qkv = jnp.dot(x, wqkv_ref[l], preferred_element_type=jnp.float32)
        qkv = qkv + bqkv_ref[l]                                         # (BS, 3H)

        wo = wo_ref[l]                                                  # (H, H)
        acc = None
        for h in range(n_heads):
            q = qkv[:, h * head_dim:(h + 1) * head_dim]                 # (BS, Dh)
            k = qkv[:, hidden + h * head_dim:hidden + (h + 1) * head_dim]
            v = qkv[:, 2 * hidden + h * head_dim:2 * hidden + (h + 1) * head_dim]
            q3 = q.reshape(batch, seq, head_dim)
            k3 = k.reshape(batch, seq, head_dim)
            v3 = v.reshape(batch, seq, head_dim)

            s = jnp.einsum("bqd,bkd->bqk", q3, k3,
                           preferred_element_type=jnp.float32)          # (B,S,S)
            s = s * scale + mask
            s = s - jnp.max(s, axis=-1, keepdims=True)
            p = jnp.exp(s)
            p = p * pl.reciprocal(jnp.sum(p, axis=-1, keepdims=True),
                                  approx=True)
            ctx3 = jnp.einsum("bqk,bkd->bqd", p, v3,
                              preferred_element_type=jnp.float32)       # (B,S,Dh)
            ctx = ctx3.reshape(batch * seq, head_dim)                   # (BS, Dh)

            # Merge heads by accumulating the per-head slice of the output
            # projection: sum_h ctx_h @ wo[h*Dh:(h+1)*Dh, :]  ==  ctx_all @ wo.
            part = jnp.dot(ctx, wo[h * head_dim:(h + 1) * head_dim, :],
                           preferred_element_type=jnp.float32)          # (BS, H)
            acc = part if acc is None else acc + part

        attn_out = acc + bo_ref[l]
        x = _layernorm(attn_out + x, ln1g_ref[l], ln1b_ref[l], eps)

        # ---- FFN ----
        inter = jnp.dot(x, wi_ref[l],
                        preferred_element_type=jnp.float32) + bi_ref[l]
        # TODO(synk): HF Camembert uses exact erf-GELU; tanh approximation used
        # because erf is not guaranteed to lower in Mosaic.
        inter = jax.nn.gelu(inter, approximate=True)
        ffn = jnp.dot(inter, wf_ref[l],
                      preferred_element_type=jnp.float32) + bf_ref[l]
        x = _layernorm(ffn + x, ln2g_ref[l], ln2b_ref[l], eps)

    o_ref[...] = x


def fused_encoder(emb_sum, mask_bias, params):
    """emb_sum: (B*S, H) f32; mask_bias: (B, 1, S) f32 additive mask."""
    B = mask_bias.shape[0]
    S = mask_bias.shape[2]
    BS = emb_sum.shape[0]

    kernel = functools.partial(
        _encoder_kernel,
        n_layers=N_LAYERS, n_heads=N_HEADS, head_dim=HEAD_DIM, hidden=HIDDEN,
        batch=B, seq=S, scale=1.0 / math.sqrt(HEAD_DIM), eps=LN_EPS)

    inputs = (emb_sum, mask_bias,
              params["emb_ln_g"], params["emb_ln_b"],
              params["wqkv"], params["bqkv"], params["wo"], params["bo"],
              params["ln1_g"], params["ln1_b"],
              params["wi"], params["bi"], params["wf"], params["bf"],
              params["ln2_g"], params["ln2_b"])

    # Whole arrays resident in VMEM, no grid, single TensorCore: the workload
    # is tiny (<0.2 MiB total), so pipelining / megacore sharding would only
    # add overhead.  Budget-wise this also fits v7x's 64 MiB VMEM trivially.
    return pl.pallas_call(
        kernel,
        out_shape=jax.ShapeDtypeStruct((BS, HIDDEN), jnp.float32),
        in_specs=[pl.BlockSpec(memory_space=pltpu.MemorySpace.VMEM)
                  for _ in inputs],
        out_specs=pl.BlockSpec(memory_space=pltpu.MemorySpace.VMEM),
    )(*inputs)


# ---------------- parameter init (deterministic, synthetic, pre-stacked) ----
def init_params(key):
    keys = iter(jax.random.split(key, 64))

    def nrm(shape, scale=0.02):
        return (scale * jax.random.normal(next(keys), shape)).astype(jnp.float32)

    L = N_LAYERS
    return {
        "word_emb": nrm((VOCAB, HIDDEN)),
        "pos_emb": nrm((MAX_POS, HIDDEN)),
        "type_emb": nrm((2, HIDDEN)),
        "emb_ln_g": jnp.ones((1, HIDDEN), jnp.float32),
        "emb_ln_b": jnp.zeros((1, HIDDEN), jnp.float32),
        # per-layer weights, stacked on a leading layer axis; wq|wk|wv fused.
        "wqkv": nrm((L, HIDDEN, 3 * HIDDEN)),
        "bqkv": jnp.zeros((L, 1, 3 * HIDDEN), jnp.float32),
        "wo": nrm((L, HIDDEN, HIDDEN)),
        "bo": jnp.zeros((L, 1, HIDDEN), jnp.float32),
        "ln1_g": jnp.ones((L, 1, HIDDEN), jnp.float32),
        "ln1_b": jnp.zeros((L, 1, HIDDEN), jnp.float32),
        "wi": nrm((L, HIDDEN, INTER)),
        "bi": jnp.zeros((L, 1, INTER), jnp.float32),
        "wf": nrm((L, INTER, HIDDEN)),
        "bf": jnp.zeros((L, 1, HIDDEN), jnp.float32),
        "ln2_g": jnp.ones((L, 1, HIDDEN), jnp.float32),
        "ln2_b": jnp.zeros((L, 1, HIDDEN), jnp.float32),
    }


# ---------------- forward (embedding gathers in XLA, everything else fused) --
def text_encoder_forward(params, input_ids, attention_mask):
    B, S = input_ids.shape

    # RoBERTa/Camembert position ids: cumsum over non-pad tokens + padding_idx.
    not_pad = (input_ids != PAD_ID).astype(jnp.int32)
    position_ids = jnp.cumsum(not_pad, axis=1) * not_pad + PAD_ID

    word = jnp.take(params["word_emb"], input_ids, axis=0)         # (B,S,H)
    pos = jnp.take(params["pos_emb"], position_ids, axis=0)        # (B,S,H)
    ttyp = jnp.take(params["type_emb"], jnp.zeros_like(input_ids), axis=0)
    emb_sum = (word + pos + ttyp).reshape(B * S, HIDDEN)

    # HF extended attention mask: (1 - mask) * finfo(f32).min, added to scores.
    mask_bias = ((1.0 - attention_mask.astype(jnp.float32))
                 * jnp.finfo(jnp.float32).min).reshape(B, 1, S)

    last_hidden = fused_encoder(emb_sum, mask_bias, params)        # (B*S, H)
    return last_hidden.reshape(B, S, HIDDEN)[:, 0, :]              # CLS token


if __name__ == "__main__":
    key = jax.random.PRNGKey(0)
    pkey, ikey = jax.random.split(key)
    params = init_params(pkey)

    B, S = 2, 8
    input_ids = jax.random.randint(ikey, (B, S), 2, VOCAB, dtype=jnp.int32)
    attention_mask = jnp.ones((B, S), jnp.int32)
    # pad the tail of the second sequence to exercise the attention mask
    input_ids = input_ids.at[1, 6:].set(PAD_ID)
    attention_mask = attention_mask.at[1, 6:].set(0)

    fwd = jax.jit(text_encoder_forward)
    out = fwd(params, input_ids, attention_mask)
    jax.block_until_ready(out)

    assert out.shape == (B, HIDDEN) and out.dtype == jnp.float32
    assert bool(jnp.all(jnp.isfinite(out)))
    print("KERNEL_OK")
</pallas_src>

<mosaic_0001>
module attributes {stable_mosaic.version = 11 : i64} {
  func.func @_encoder_kernel(%arg0: memref<16x32xf32, #tpu.memory_space<vmem>>, %arg1: memref<2x1x8xf32, #tpu.memory_space<vmem>>, %arg2: memref<1x32xf32, #tpu.memory_space<vmem>>, %arg3: memref<1x32xf32, #tpu.memory_space<vmem>>, %arg4: memref<2x32x96xf32, #tpu.memory_space<vmem>>, %arg5: memref<2x1x96xf32, #tpu.memory_space<vmem>>, %arg6: memref<2x32x32xf32, #tpu.memory_space<vmem>>, %arg7: memref<2x1x32xf32, #tpu.memory_space<vmem>>, %arg8: memref<2x1x32xf32, #tpu.memory_space<vmem>>, %arg9: memref<2x1x32xf32, #tpu.memory_space<vmem>>, %arg10: memref<2x32x64xf32, #tpu.memory_space<vmem>>, %arg11: memref<2x1x64xf32, #tpu.memory_space<vmem>>, %arg12: memref<2x64x32xf32, #tpu.memory_space<vmem>>, %arg13: memref<2x1x32xf32, #tpu.memory_space<vmem>>, %arg14: memref<2x1x32xf32, #tpu.memory_space<vmem>>, %arg15: memref<2x1x32xf32, #tpu.memory_space<vmem>>, %arg16: memref<16x32xf32, #tpu.memory_space<vmem>>) attributes {dimension_semantics = [], scalar_prefetch = 0 : i64, scratch_operands = 0 : i64, tpu.core_type = #tpu.core_type<tc>} {
    %c0 = arith.constant 0 : index
    %c0_0 = arith.constant 0 : index
    %0 = vector.load %arg0[%c0, %c0_0] : memref<16x32xf32, #tpu.memory_space<vmem>>, vector<16x32xf32>
    %c0_1 = arith.constant 0 : index
    %c0_2 = arith.constant 0 : index
    %1 = vector.load %arg2[%c0_1, %c0_2] : memref<1x32xf32, #tpu.memory_space<vmem>>, vector<1x32xf32>
    %c0_3 = arith.constant 0 : index
    %c0_4 = arith.constant 0 : index
    %2 = vector.load %arg3[%c0_3, %c0_4] : memref<1x32xf32, #tpu.memory_space<vmem>>, vector<1x32xf32>
    %cst = arith.constant dense<0.000000e+00> : vector<16xf32>
    %3 = vector.multi_reduction <add>, %0, %cst [1] : vector<16x32xf32> to vector<16xf32>
    %4 = vector.shape_cast %3 : vector<16xf32> to vector<16x1xf32>
    %cst_5 = arith.constant 3.200000e+01 : f32
    %5 = vector.broadcast %cst_5 : f32 to vector<16x1xf32>
    %6 = arith.divf %4, %5 : vector<16x1xf32>
    %7 = vector.broadcast %6 : vector<16x1xf32> to vector<16x32xf32>
    %8 = arith.subf %0, %7 : vector<16x32xf32>
    %9 = arith.mulf %8, %8 : vector<16x32xf32>
    %cst_6 = arith.constant dense<0.000000e+00> : vector<16xf32>
    %10 = vector.multi_reduction <add>, %9, %cst_6 [1] : vector<16x32xf32> to vector<16xf32>
    %11 = vector.shape_cast %10 : vector<16xf32> to vector<16x1xf32>
    %cst_7 = arith.constant 3.200000e+01 : f32
    %12 = vector.broadcast %cst_7 : f32 to vector<16x1xf32>
    %13 = arith.divf %11, %12 : vector<16x1xf32>
    %14 = vector.broadcast %6 : vector<16x1xf32> to vector<16x32xf32>
    %15 = arith.subf %0, %14 : vector<16x32xf32>
    %cst_8 = arith.constant 9.99999996E-13 : f32
    %16 = vector.broadcast %cst_8 : f32 to vector<16x1xf32>
    %17 = arith.addf %13, %16 : vector<16x1xf32>
    %18 = math.rsqrt %17 : vector<16x1xf32>
    %19 = vector.broadcast %18 : vector<16x1xf32> to vector<16x32xf32>
    %20 = arith.mulf %15, %19 : vector<16x32xf32>
    %21 = vector.broadcast %1 : vector<1x32xf32> to vector<16x32xf32>
    %22 = arith.mulf %20, %21 : vector<16x32xf32>
    %23 = vector.broadcast %2 : vector<1x32xf32> to vector<16x32xf32>
    %24 = arith.addf %22, %23 : vector<16x32xf32>
    %c0_9 = arith.constant 0 : index
    %c0_10 = arith.constant 0 : index
    %c0_11 = arith.constant 0 : index
    %25 = vector.load %arg1[%c0_9, %c0_10, %c0_11] : memref<2x1x8xf32, #tpu.memory_space<vmem>>, vector<2x1x8xf32>
    %c0_12 = arith.constant 0 : index
    %c0_13 = arith.constant 0 : index
    %c0_14 = arith.constant 0 : index
    %26 = vector.load %arg4[%c0_12, %c0_13, %c0_14] : memref<2x32x96xf32, #tpu.memory_space<vmem>>, vector<1x32x96xf32>
    %27 = vector.shape_cast %26 : vector<1x32x96xf32> to vector<32x96xf32>
    %cst_15 = arith.constant dense<0.000000e+00> : vector<16x96xf32>
    %28 = tpu.matmul %24, %27, %cst_15 {dimension_numbers = #tpu.dot_dimension_numbers<[1], [0], [0], [1], [0, 0, 1, 1], [], []>} : vector<16x32xf32>, vector<32x96xf32>, vector<16x96xf32> -> vector<16x96xf32>
    %c0_16 = arith.constant 0 : index
    %c0_17 = arith.constant 0 : index
    %c0_18 = arith.constant 0 : index
    %29 = vector.load %arg5[%c0_16, %c0_17, %c0_18] : memref<2x1x96xf32, #tpu.memory_space<vmem>>, vector<1x1x96xf32>
    %30 = vector.shape_cast %29 : vector<1x1x96xf32> to vector<1x96xf32>
    %31 = vector.broadcast %30 : vector<1x96xf32> to vector<16x96xf32>
    %32 = arith.addf %28, %31 : vector<16x96xf32>
    %c0_19 = arith.constant 0 : index
    %c0_20 = arith.constant 0 : index
    %c0_21 = arith.constant 0 : index
    %33 = vector.load %arg6[%c0_19, %c0_20, %c0_21] : memref<2x32x32xf32, #tpu.memory_space<vmem>>, vector<1x32x32xf32>
    %34 = vector.shape_cast %33 : vector<1x32x32xf32> to vector<32x32xf32>
    %35 = vector.extract_strided_slice %32 {offsets = [0, 0], sizes = [16, 16], strides = [1, 1]} : vector<16x96xf32> to vector<16x16xf32>
    %36 = vector.extract_strided_slice %32 {offsets = [0, 32], sizes = [16, 16], strides = [1, 1]} : vector<16x96xf32> to vector<16x16xf32>
    %37 = vector.extract_strided_slice %32 {offsets = [0, 64], sizes = [16, 16], strides = [1, 1]} : vector<16x96xf32> to vector<16x16xf32>
    %38 = vector.shape_cast %35 : vector<16x16xf32> to vector<2x8x16xf32>
    %39 = vector.shape_cast %36 : vector<16x16xf32> to vector<2x8x16xf32>
    %40 = vector.shape_cast %37 : vector<16x16xf32> to vector<2x8x16xf32>
    "tpu.trace_start"() <{level = 10 : i32, message = "bqd,bkd->bqk"}> : () -> ()
    %cst_22 = arith.constant dense<0.000000e+00> : vector<2x8x8xf32>
    %41 = tpu.matmul %38, %39, %cst_22 {dimension_numbers = #tpu.dot_dimension_numbers<[2], [2], [1], [1], [0, 0, 0, 1, 1, 1], [0], [0]>} : vector<2x8x16xf32>, vector<2x8x16xf32>, vector<2x8x8xf32> -> vector<2x8x8xf32>
    "tpu.trace_stop"() : () -> ()
    %cst_23 = arith.constant 2.500000e-01 : f32
    %42 = vector.broadcast %cst_23 : f32 to vector<2x8x8xf32>
    %43 = arith.mulf %41, %42 : vector<2x8x8xf32>
    %44 = vector.broadcast %25 : vector<2x1x8xf32> to vector<2x8x8xf32>
    %45 = arith.addf %43, %44 : vector<2x8x8xf32>
    %cst_24 = arith.constant dense<0xFF800000> : vector<2x8xf32>
    %46 = vector.multi_reduction <maximumf>, %45, %cst_24 [2] : vector<2x8x8xf32> to vector<2x8xf32>
    %47 = vector.shape_cast %46 : vector<2x8xf32> to vector<2x8x1xf32>
    %48 = vector.broadcast %47 : vector<2x8x1xf32> to vector<2x8x8xf32>
    %49 = arith.subf %45, %48 : vector<2x8x8xf32>
    %50 = math.exp %49 : vector<2x8x8xf32>
    %cst_25 = arith.constant dense<0.000000e+00> : vector<2x8xf32>
    %51 = vector.multi_reduction <add>, %50, %cst_25 [2] : vector<2x8x8xf32> to vector<2x8xf32>
    %52 = vector.shape_cast %51 : vector<2x8xf32> to vector<2x8x1xf32>
    %53 = tpu.reciprocal %52 {approx = true} : vector<2x8x1xf32> -> vector<2x8x1xf32>
    %54 = vector.broadcast %53 : vector<2x8x1xf32> to vector<2x8x8xf32>
    %55 = arith.mulf %50, %54 : vector<2x8x8xf32>
    "tpu.trace_start"() <{level = 10 : i32, message = "bqk,bkd->bqd"}> : () -> ()
    %cst_26 = arith.constant dense<0.000000e+00> : vector<2x8x16xf32>
    %56 = tpu.matmul %55, %40, %cst_26 {dimension_numbers = #tpu.dot_dimension_numbers<[2], [1], [1], [2], [0, 0, 0, 1, 1, 2], [0], [0]>} : vector<2x8x8xf32>, vector<2x8x16xf32>, vector<2x8x16xf32> -> vector<2x8x16xf32>
    "tpu.trace_stop"() : () -> ()
    %57 = vector.shape_cast %56 : vector<2x8x16xf32> to vector<16x16xf32>
    %58 = vector.extract_strided_slice %34 {offsets = [0, 0], sizes = [16, 32], strides = [1, 1]} : vector<32x32xf32> to vector<16x32xf32>
    %cst_27 = arith.constant dense<0.000000e+00> : vector<16x32xf32>
    %59 = tpu.matmul %57, %58, %cst_27 {dimension_numbers = #tpu.dot_dimension_numbers<[1], [0], [0], [1], [0, 0, 1, 1], [], []>} : vector<16x16xf32>, vector<16x32xf32>, vector<16x32xf32> -> vector<16x32xf32>
    %60 = vector.extract_strided_slice %32 {offsets = [0, 16], sizes = [16, 16], strides = [1, 1]} : vector<16x96xf32> to vector<16x16xf32>
    %61 = vector.extract_strided_slice %32 {offsets = [0, 48], sizes = [16, 16], strides = [1, 1]} : vector<16x96xf32> to vector<16x16xf32>
    %62 = vector.extract_strided_slice %32 {offsets = [0, 80], sizes = [16, 16], strides = [1, 1]} : vector<16x96xf32> to vector<16x16xf32>
    %63 = vector.shape_cast %60 : vector<16x16xf32> to vector<2x8x16xf32>
    %64 = vector.shape_cast %61 : vector<16x16xf32> to vector<2x8x16xf32>
    %65 = vector.shape_cast %62 : vector<16x16xf32> to vector<2x8x16xf32>
    "tpu.trace_start"() <{level = 10 : i32, message = "bqd,bkd->bqk"}> : () -> ()
    %cst_28 = arith.constant dense<0.000000e+00> : vector<2x8x8xf32>
    %66 = tpu.matmul %63, %64, %cst_28 {dimension_numbers = #tpu.dot_dimension_numbers<[2], [2], [1], [1], [0, 0, 0, 1, 1, 1], [0], [0]>} : vector<2x8x16xf32>, vector<2x8x16xf32>, vector<2x8x8xf32> -> vector<2x8x8xf32>
    "tpu.trace_stop"() : () -> ()
    %cst_29 = arith.constant 2.500000e-01 : f32
    %67 = vector.broadcast %cst_29 : f32 to vector<2x8x8xf32>
    %68 = arith.mulf %66, %67 : vector<2x8x8xf32>
    %69 = vector.broadcast %25 : vector<2x1x8xf32> to vector<2x8x8xf32>
    %70 = arith.addf %68, %69 : vector<2x8x8xf32>
    %cst_30 = arith.constant dense<0xFF800000> : vector<2x8xf32>
    %71 = vector.multi_reduction <maximumf>, %70, %cst_30 [2] : vector<2x8x8xf32> to vector<2x8xf32>
    %72 = vector.shape_cast %71 : vector<2x8xf32> to vector<2x8x1xf32>
    %73 = vector.broadcast %72 : vector<2x8x1xf32> to vector<2x8x8xf32>
    %74 = arith.subf %70, %73 : vector<2x8x8xf32>
    %75 = math.exp %74 : vector<2x8x8xf32>
    %cst_31 = arith.constant dense<0.000000e+00> : vector<2x8xf32>
    %76 = vector.multi_reduction <add>, %75, %cst_31 [2] : vector<2x8x8xf32> to vector<2x8xf32>
    %77 = vector.shape_cast %76 : vector<2x8xf32> to vector<2x8x1xf32>
    %78 = tpu.reciprocal %77 {approx = true} : vector<2x8x1xf32> -> vector<2x8x1xf32>
    %79 = vector.broadcast %78 : vector<2x8x1xf32> to vector<2x8x8xf32>
    %80 = arith.mulf %75, %79 : vector<2x8x8xf32>
    "tpu.trace_start"() <{level = 10 : i32, message = "bqk,bkd->bqd"}> : () -> ()
    %cst_32 = arith.constant dense<0.000000e+00> : vector<2x8x16xf32>
    %81 = tpu.matmul %80, %65, %cst_32 {dimension_numbers = #tpu.dot_dimension_numbers<[2], [1], [1], [2], [0, 0, 0, 1, 1, 2], [0], [0]>} : vector<2x8x8xf32>, vector<2x8x16xf32>, vector<2x8x16xf32> -> vector<2x8x16xf32>
    "tpu.trace_stop"() : () -> ()
    %82 = vector.shape_cast %81 : vector<2x8x16xf32> to vector<16x16xf32>
    %83 = vector.extract_strided_slice %34 {offsets = [16, 0], sizes = [16, 32], strides = [1, 1]} : vector<32x32xf32> to vector<16x32xf32>
    %cst_33 = arith.constant dense<0.000000e+00> : vector<16x32xf32>
    %84 = tpu.matmul %82, %83, %cst_33 {dimension_numbers = #tpu.dot_dimension_numbers<[1], [0], [0], [1], [0, 0, 1, 1], [], []>} : vector<16x16xf32>, vector<16x32xf32>, vector<16x32xf32> -> vector<16x32xf32>
    %85 = arith.addf %59, %84 : vector<16x32xf32>
    %c0_34 = arith.constant 0 : index
    %c0_35 = arith.constant 0 : index
    %c0_36 = arith.constant 0 : index
    %86 = vector.load %arg7[%c0_34, %c0_35, %c0_36] : memref<2x1x32xf32, #tpu.memory_space<vmem>>, vector<1x1x32xf32>
    %87 = vector.shape_cast %86 : vector<1x1x32xf32> to vector<1x32xf32>
    %88 = vector.broadcast %87 : vector<1x32xf32> to vector<16x32xf32>
    %89 = arith.addf %85, %88 : vector<16x32xf32>
    %90 = arith.addf %89, %24 : vector<16x32xf32>
    %c0_37 = arith.constant 0 : index
    %c0_38 = arith.constant 0 : index
    %c0_39 = arith.constant 0 : index
    %91 = vector.load %arg8[%c0_37, %c0_38, %c0_39] : memref<2x1x32xf32, #tpu.memory_space<vmem>>, vector<1x1x32xf32>
    %92 = vector.shape_cast %91 : vector<1x1x32xf32> to vector<1x32xf32>
    %c0_40 = arith.constant 0 : index
    %c0_41 = arith.constant 0 : index
    %c0_42 = arith.constant 0 : index
    %93 = vector.load %arg9[%c0_40, %c0_41, %c0_42] : memref<2x1x32xf32, #tpu.memory_space<vmem>>, vector<1x1x32xf32>
    %94 = vector.shape_cast %93 : vector<1x1x32xf32> to vector<1x32xf32>
    %cst_43 = arith.constant dense<0.000000e+00> : vector<16xf32>
    %95 = vector.multi_reduction <add>, %90, %cst_43 [1] : vector<16x32xf32> to vector<16xf32>
    %96 = vector.shape_cast %95 : vector<16xf32> to vector<16x1xf32>
    %cst_44 = arith.constant 3.200000e+01 : f32
    %97 = vector.broadcast %cst_44 : f32 to vector<16x1xf32>
    %98 = arith.divf %96, %97 : vector<16x1xf32>
    %99 = vector.broadcast %98 : vector<16x1xf32> to vector<16x32xf32>
    %100 = arith.subf %90, %99 : vector<16x32xf32>
    %101 = arith.mulf %100, %100 : vector<16x32xf32>
    %cst_45 = arith.constant dense<0.000000e+00> : vector<16xf32>
    %102 = vector.multi_reduction <add>, %101, %cst_45 [1] : vector<16x32xf32> to vector<16xf32>
    %103 = vector.shape_cast %102 : vector<16xf32> to vector<16x1xf32>
    %cst_46 = arith.constant 3.200000e+01 : f32
    %104 = vector.broadcast %cst_46 : f32 to vector<16x1xf32>
    %105 = arith.divf %103, %104 : vector<16x1xf32>
    %106 = vector.broadcast %98 : vector<16x1xf32> to vector<16x32xf32>
    %107 = arith.subf %90, %106 : vector<16x32xf32>
    %cst_47 = arith.constant 9.99999996E-13 : f32
    %108 = vector.broadcast %cst_47 : f32 to vector<16x1xf32>
    %109 = arith.addf %105, %108 : vector<16x1xf32>
    %110 = math.rsqrt %109 : vector<16x1xf32>
    %111 = vector.broadcast %110 : vector<16x1xf32> to vector<16x32xf32>
    %112 = arith.mulf %107, %111 : vector<16x32xf32>
    %113 = vector.broadcast %92 : vector<1x32xf32> to vector<16x32xf32>
    %114 = arith.mulf %112, %113 : vector<16x32xf32>
    %115 = vector.broadcast %94 : vector<1x32xf32> to vector<16x32xf32>
    %116 = arith.addf %114, %115 : vector<16x32xf32>
    %c0_48 = arith.constant 0 : index
    %c0_49 = arith.constant 0 : index
    %c0_50 = arith.constant 0 : index
    %117 = vector.load %arg10[%c0_48, %c0_49, %c0_50] : memref<2x32x64xf32, #tpu.memory_space<vmem>>, vector<1x32x64xf32>
    %118 = vector.shape_cast %117 : vector<1x32x64xf32> to vector<32x64xf32>
    %cst_51 = arith.constant dense<0.000000e+00> : vector<16x64xf32>
    %119 = tpu.matmul %116, %118, %cst_51 {dimension_numbers = #tpu.dot_dimension_numbers<[1], [0], [0], [1], [0, 0, 1, 1], [], []>} : vector<16x32xf32>, vector<32x64xf32>, vector<16x64xf32> -> vector<16x64xf32>
    %c0_52 = arith.constant 0 : index
    %c0_53 = arith.constant 0 : index
    %c0_54 = arith.constant 0 : index
    %120 = vector.load %arg11[%c0_52, %c0_53, %c0_54] : memref<2x1x64xf32, #tpu.memory_space<vmem>>, vector<1x1x64xf32>
    %121 = vector.shape_cast %120 : vector<1x1x64xf32> to vector<1x64xf32>
    %122 = vector.broadcast %121 : vector<1x64xf32> to vector<16x64xf32>
    %123 = arith.addf %119, %122 : vector<16x64xf32>
    %124 = arith.mulf %123, %123 : vector<16x64xf32>
    %125 = arith.mulf %123, %124 : vector<16x64xf32>
    %cst_55 = arith.constant 4.471500e-02 : f32
    %126 = vector.broadcast %cst_55 : f32 to vector<16x64xf32>
    %127 = arith.mulf %126, %125 : vector<16x64xf32>
    %128 = arith.addf %123, %127 : vector<16x64xf32>
    %cst_56 = arith.constant 0.797884583 : f32
    %129 = vector.broadcast %cst_56 : f32 to vector<16x64xf32>
    %130 = arith.mulf %129, %128 : vector<16x64xf32>
    %131 = math.tanh %130 : vector<16x64xf32>
    %cst_57 = arith.constant 1.000000e+00 : f32
    %132 = vector.broadcast %cst_57 : f32 to vector<16x64xf32>
    %133 = arith.addf %132, %131 : vector<16x64xf32>
    %cst_58 = arith.constant 5.000000e-01 : f32
    %134 = vector.broadcast %cst_58 : f32 to vector<16x64xf32>
    %135 = arith.mulf %134, %133 : vector<16x64xf32>
    %136 = arith.mulf %123, %135 : vector<16x64xf32>
    %c0_59 = arith.constant 0 : index
    %c0_60 = arith.constant 0 : index
    %c0_61 = arith.constant 0 : index
    %137 = vector.load %arg12[%c0_59, %c0_60, %c0_61] : memref<2x64x32xf32, #tpu.memory_space<vmem>>, vector<1x64x32xf32>
    %138 = vector.shape_cast %137 : vector<1x64x32xf32> to vector<64x32xf32>
    %cst_62 = arith.constant dense<0.000000e+00> : vector<16x32xf32>
    %139 = tpu.matmul %136, %138, %cst_62 {dimension_numbers = #tpu.dot_dimension_numbers<[1], [0], [0], [1], [0, 0, 1, 1], [], []>} : vector<16x64xf32>, vector<64x32xf32>, vector<16x32xf32> -> vector<16x32xf32>
    %c0_63 = arith.constant 0 : index
    %c0_64 = arith.constant 0 : index
    %c0_65 = arith.constant 0 : index
    %140 = vector.load %arg13[%c0_63, %c0_64, %c0_65] : memref<2x1x32xf32, #tpu.memory_space<vmem>>, vector<1x1x32xf32>
    %141 = vector.shape_cast %140 : vector<1x1x32xf32> to vector<1x32xf32>
    %142 = vector.broadcast %141 : vector<1x32xf32> to vector<16x32xf32>
    %143 = arith.addf %139, %142 : vector<16x32xf32>
    %144 = arith.addf %143, %116 : vector<16x32xf32>
    %c0_66 = arith.constant 0 : index
    %c0_67 = arith.constant 0 : index
    %c0_68 = arith.constant 0 : index
    %145 = vector.load %arg14[%c0_66, %c0_67, %c0_68] : memref<2x1x32xf32, #tpu.memory_space<vmem>>, vector<1x1x32xf32>
    %146 = vector.shape_cast %145 : vector<1x1x32xf32> to vector<1x32xf32>
    %c0_69 = arith.constant 0 : index
    %c0_70 = arith.constant 0 : index
    %c0_71 = arith.constant 0 : index
    %147 = vector.load %arg15[%c0_69, %c0_70, %c0_71] : memref<2x1x32xf32, #tpu.memory_space<vmem>>, vector<1x1x32xf32>
    %148 = vector.shape_cast %147 : vector<1x1x32xf32> to vector<1x32xf32>
    %cst_72 = arith.constant dense<0.000000e+00> : vector<16xf32>
    %149 = vector.multi_reduction <add>, %144, %cst_72 [1] : vector<16x32xf32> to vector<16xf32>
    %150 = vector.shape_cast %149 : vector<16xf32> to vector<16x1xf32>
    %cst_73 = arith.constant 3.200000e+01 : f32
    %151 = vector.broadcast %cst_73 : f32 to vector<16x1xf32>
    %152 = arith.divf %150, %151 : vector<16x1xf32>
    %153 = vector.broadcast %152 : vector<16x1xf32> to vector<16x32xf32>
    %154 = arith.subf %144, %153 : vector<16x32xf32>
    %155 = arith.mulf %154, %154 : vector<16x32xf32>
    %cst_74 = arith.constant dense<0.000000e+00> : vector<16xf32>
    %156 = vector.multi_reduction <add>, %155, %cst_74 [1] : vector<16x32xf32> to vector<16xf32>
    %157 = vector.shape_cast %156 : vector<16xf32> to vector<16x1xf32>
    %cst_75 = arith.constant 3.200000e+01 : f32
    %158 = vector.broadcast %cst_75 : f32 to vector<16x1xf32>
    %159 = arith.divf %157, %158 : vector<16x1xf32>
    %160 = vector.broadcast %152 : vector<16x1xf32> to vector<16x32xf32>
    %161 = arith.subf %144, %160 : vector<16x32xf32>
    %cst_76 = arith.constant 9.99999996E-13 : f32
    %162 = vector.broadcast %cst_76 : f32 to vector<16x1xf32>
    %163 = arith.addf %159, %162 : vector<16x1xf32>
    %164 = math.rsqrt %163 : vector<16x1xf32>
    %165 = vector.broadcast %164 : vector<16x1xf32> to vector<16x32xf32>
    %166 = arith.mulf %161, %165 : vector<16x32xf32>
    %167 = vector.broadcast %146 : vector<1x32xf32> to vector<16x32xf32>
    %168 = arith.mulf %166, %167 : vector<16x32xf32>
    %169 = vector.broadcast %148 : vector<1x32xf32> to vector<16x32xf32>
    %170 = arith.addf %168, %169 : vector<16x32xf32>
    %c1 = arith.constant 1 : index
    %c0_77 = arith.constant 0 : index
    %c0_78 = arith.constant 0 : index
    %171 = vector.load %arg4[%c1, %c0_77, %c0_78] : memref<2x32x96xf32, #tpu.memory_space<vmem>>, vector<1x32x96xf32>
    %172 = vector.shape_cast %171 : vector<1x32x96xf32> to vector<32x96xf32>
    %cst_79 = arith.constant dense<0.000000e+00> : vector<16x96xf32>
    %173 = tpu.matmul %170, %172, %cst_79 {dimension_numbers = #tpu.dot_dimension_numbers<[1], [0], [0], [1], [0, 0, 1, 1], [], []>} : vector<16x32xf32>, vector<32x96xf32>, vector<16x96xf32> -> vector<16x96xf32>
    %c1_80 = arith.constant 1 : index
    %c0_81 = arith.constant 0 : index
    %c0_82 = arith.constant 0 : index
    %174 = vector.load %arg5[%c1_80, %c0_81, %c0_82] : memref<2x1x96xf32, #tpu.memory_space<vmem>>, vector<1x1x96xf32>
    %175 = vector.shape_cast %174 : vector<1x1x96xf32> to vector<1x96xf32>
    %176 = vector.broadcast %175 : vector<1x96xf32> to vector<16x96xf32>
    %177 = arith.addf %173, %176 : vector<16x96xf32>
    %c1_83 = arith.constant 1 : index
    %c0_84 = arith.constant 0 : index
    %c0_85 = arith.constant 0 : index
    %178 = vector.load %arg6[%c1_83, %c0_84, %c0_85] : memref<2x32x32xf32, #tpu.memory_space<vmem>>, vector<1x32x32xf32>
    %179 = vector.shape_cast %178 : vector<1x32x32xf32> to vector<32x32xf32>
    %180 = vector.extract_strided_slice %177 {offsets = [0, 0], sizes = [16, 16], strides = [1, 1]} : vector<16x96xf32> to vector<16x16xf32>
    %181 = vector.extract_strided_slice %177 {offsets = [0, 32], sizes = [16, 16], strides = [1, 1]} : vector<16x96xf32> to vector<16x16xf32>
    %182 = vector.extract_strided_slice %177 {offsets = [0, 64], sizes = [16, 16], strides = [1, 1]} : vector<16x96xf32> to vector<16x16xf32>
    %183 = vector.shape_cast %180 : vector<16x16xf32> to vector<2x8x16xf32>
    %184 = vector.shape_cast %181 : vector<16x16xf32> to vector<2x8x16xf32>
    %185 = vector.shape_cast %182 : vector<16x16xf32> to vector<2x8x16xf32>
    "tpu.trace_start"() <{level = 10 : i32, message = "bqd,bkd->bqk"}> : () -> ()
    %cst_86 = arith.constant dense<0.000000e+00> : vector<2x8x8xf32>
    %186 = tpu.matmul %183, %184, %cst_86 {dimension_numbers = #tpu.dot_dimension_numbers<[2], [2], [1], [1], [0, 0, 0, 1, 1, 1], [0], [0]>} : vector<2x8x16xf32>, vector<2x8x16xf32>, vector<2x8x8xf32> -> vector<2x8x8xf32>
    "tpu.trace_stop"() : () -> ()
    %cst_87 = arith.constant 2.500000e-01 : f32
    %187 = vector.broadcast %cst_87 : f32 to vector<2x8x8xf32>
    %188 = arith.mulf %186, %187 : vector<2x8x8xf32>
    %189 = vector.broadcast %25 : vector<2x1x8xf32> to vector<2x8x8xf32>
    %190 = arith.addf %188, %189 : vector<2x8x8xf32>
    %cst_88 = arith.constant dense<0xFF800000> : vector<2x8xf32>
    %191 = vector.multi_reduction <maximumf>, %190, %cst_88 [2] : vector<2x8x8xf32> to vector<2x8xf32>
    %192 = vector.shape_cast %191 : vector<2x8xf32> to vector<2x8x1xf32>
    %193 = vector.broadcast %192 : vector<2x8x1xf32> to vector<2x8x8xf32>
    %194 = arith.subf %190, %193 : vector<2x8x8xf32>
    %195 = math.exp %194 : vector<2x8x8xf32>
    %cst_89 = arith.constant dense<0.000000e+00> : vector<2x8xf32>
    %196 = vector.multi_reduction <add>, %195, %cst_89 [2] : vector<2x8x8xf32> to vector<2x8xf32>
    %197 = vector.shape_cast %196 : vector<2x8xf32> to vector<2x8x1xf32>
    %198 = tpu.reciprocal %197 {approx = true} : vector<2x8x1xf32> -> vector<2x8x1xf32>
    %199 = vector.broadcast %198 : vector<2x8x1xf32> to vector<2x8x8xf32>
    %200 = arith.mulf %195, %199 : vector<2x8x8xf32>
    "tpu.trace_start"() <{level = 10 : i32, message = "bqk,bkd->bqd"}> : () -> ()
    %cst_90 = arith.constant dense<0.000000e+00> : vector<2x8x16xf32>
    %201 = tpu.matmul %200, %185, %cst_90 {dimension_numbers = #tpu.dot_dimension_numbers<[2], [1], [1], [2], [0, 0, 0, 1, 1, 2], [0], [0]>} : vector<2x8x8xf32>, vector<2x8x16xf32>, vector<2x8x16xf32> -> vector<2x8x16xf32>
    "tpu.trace_stop"() : () -> ()
    %202 = vector.shape_cast %201 : vector<2x8x16xf32> to vector<16x16xf32>
    %203 = vector.extract_strided_slice %179 {offsets = [0, 0], sizes = [16, 32], strides = [1, 1]} : vector<32x32xf32> to vector<16x32xf32>
    %cst_91 = arith.constant dense<0.000000e+00> : vector<16x32xf32>
    %204 = tpu.matmul %202, %203, %cst_91 {dimension_numbers = #tpu.dot_dimension_numbers<[1], [0], [0], [1], [0, 0, 1, 1], [], []>} : vector<16x16xf32>, vector<16x32xf32>, vector<16x32xf32> -> vector<16x32xf32>
    %205 = vector.extract_strided_slice %177 {offsets = [0, 16], sizes = [16, 16], strides = [1, 1]} : vector<16x96xf32> to vector<16x16xf32>
    %206 = vector.extract_strided_slice %177 {offsets = [0, 48], sizes = [16, 16], strides = [1, 1]} : vector<16x96xf32> to vector<16x16xf32>
    %207 = vector.extract_strided_slice %177 {offsets = [0, 80], sizes = [16, 16], strides = [1, 1]} : vector<16x96xf32> to vector<16x16xf32>
    %208 = vector.shape_cast %205 : vector<16x16xf32> to vector<2x8x16xf32>
    %209 = vector.shape_cast %206 : vector<16x16xf32> to vector<2x8x16xf32>
    %210 = vector.shape_cast %207 : vector<16x16xf32> to vector<2x8x16xf32>
    "tpu.trace_start"() <{level = 10 : i32, message = "bqd,bkd->bqk"}> : () -> ()
    %cst_92 = arith.constant dense<0.000000e+00> : vector<2x8x8xf32>
    %211 = tpu.matmul %208, %209, %cst_92 {dimension_numbers = #tpu.dot_dimension_numbers<[2], [2], [1], [1], [0, 0, 0, 1, 1, 1], [0], [0]>} : vector<2x8x16xf32>, vector<2x8x16xf32>, vector<2x8x8xf32> -> vector<2x8x8xf32>
    "tpu.trace_stop"() : () -> ()
    %cst_93 = arith.constant 2.500000e-01 : f32
    %212 = vector.broadcast %cst_93 : f32 to vector<2x8x8xf32>
    %213 = arith.mulf %211, %212 : vector<2x8x8xf32>
    %214 = vector.broadcast %25 : vector<2x1x8xf32> to vector<2x8x8xf32>
    %215 = arith.addf %213, %214 : vector<2x8x8xf32>
    %cst_94 = arith.constant dense<0xFF800000> : vector<2x8xf32>
    %216 = vector.multi_reduction <maximumf>, %215, %cst_94 [2] : vector<2x8x8xf32> to vector<2x8xf32>
    %217 = vector.shape_cast %216 : vector<2x8xf32> to vector<2x8x1xf32>
    %218 = vector.broadcast %217 : vector<2x8x1xf32> to vector<2x8x8xf32>
    %219 = arith.subf %215, %218 : vector<2x8x8xf32>
    %220 = math.exp %219 : vector<2x8x8xf32>
    %cst_95 = arith.constant dense<0.000000e+00> : vector<2x8xf32>
    %221 = vector.multi_reduction <add>, %220, %cst_95 [2] : vector<2x8x8xf32> to vector<2x8xf32>
    %222 = vector.shape_cast %221 : vector<2x8xf32> to vector<2x8x1xf32>
    %223 = tpu.reciprocal %222 {approx = true} : vector<2x8x1xf32> -> vector<2x8x1xf32>
    %224 = vector.broadcast %223 : vector<2x8x1xf32> to vector<2x8x8xf32>
    %225 = arith.mulf %220, %224 : vector<2x8x8xf32>
    "tpu.trace_start"() <{level = 10 : i32, message = "bqk,bkd->bqd"}> : () -> ()
    %cst_96 = arith.constant dense<0.000000e+00> : vector<2x8x16xf32>
    %226 = tpu.matmul %225, %210, %cst_96 {dimension_numbers = #tpu.dot_dimension_numbers<[2], [1], [1], [2], [0, 0, 0, 1, 1, 2], [0], [0]>} : vector<2x8x8xf32>, vector<2x8x16xf32>, vector<2x8x16xf32> -> vector<2x8x16xf32>
    "tpu.trace_stop"() : () -> ()
    %227 = vector.shape_cast %226 : vector<2x8x16xf32> to vector<16x16xf32>
    %228 = vector.extract_strided_slice %179 {offsets = [16, 0], sizes = [16, 32], strides = [1, 1]} : vector<32x32xf32> to vector<16x32xf32>
    %cst_97 = arith.constant dense<0.000000e+00> : vector<16x32xf32>
    %229 = tpu.matmul %227, %228, %cst_97 {dimension_numbers = #tpu.dot_dimension_numbers<[1], [0], [0], [1], [0, 0, 1, 1], [], []>} : vector<16x16xf32>, vector<16x32xf32>, vector<16x32xf32> -> vector<16x32xf32>
    %230 = arith.addf %204, %229 : vector<16x32xf32>
    %c1_98 = arith.constant 1 : index
    %c0_99 = arith.constant 0 : index
    %c0_100 = arith.constant 0 : index
    %231 = vector.load %arg7[%c1_98, %c0_99, %c0_100] : memref<2x1x32xf32, #tpu.memory_space<vmem>>, vector<1x1x32xf32>
    %232 = vector.shape_cast %231 : vector<1x1x32xf32> to vector<1x32xf32>
    %233 = vector.broadcast %232 : vector<1x32xf32> to vector<16x32xf32>
    %234 = arith.addf %230, %233 : vector<16x32xf32>
    %235 = arith.addf %234, %170 : vector<16x32xf32>
    %c1_101 = arith.constant 1 : index
    %c0_102 = arith.constant 0 : index
    %c0_103 = arith.constant 0 : index
    %236 = vector.load %arg8[%c1_101, %c0_102, %c0_103] : memref<2x1x32xf32, #tpu.memory_space<vmem>>, vector<1x1x32xf32>
    %237 = vector.shape_cast %236 : vector<1x1x32xf32> to vector<1x32xf32>
    %c1_104 = arith.constant 1 : index
    %c0_105 = arith.constant 0 : index
    %c0_106 = arith.constant 0 : index
    %238 = vector.load %arg9[%c1_104, %c0_105, %c0_106] : memref<2x1x32xf32, #tpu.memory_space<vmem>>, vector<1x1x32xf32>
    %239 = vector.shape_cast %238 : vector<1x1x32xf32> to vector<1x32xf32>
    %cst_107 = arith.constant dense<0.000000e+00> : vector<16xf32>
    %240 = vector.multi_reduction <add>, %235, %cst_107 [1] : vector<16x32xf32> to vector<16xf32>
    %241 = vector.shape_cast %240 : vector<16xf32> to vector<16x1xf32>
    %cst_108 = arith.constant 3.200000e+01 : f32
    %242 = vector.broadcast %cst_108 : f32 to vector<16x1xf32>
    %243 = arith.divf %241, %242 : vector<16x1xf32>
    %244 = vector.broadcast %243 : vector<16x1xf32> to vector<16x32xf32>
    %245 = arith.subf %235, %244 : vector<16x32xf32>
    %246 = arith.mulf %245, %245 : vector<16x32xf32>
    %cst_109 = arith.constant dense<0.000000e+00> : vector<16xf32>
    %247 = vector.multi_reduction <add>, %246, %cst_109 [1] : vector<16x32xf32> to vector<16xf32>
    %248 = vector.shape_cast %247 : vector<16xf32> to vector<16x1xf32>
    %cst_110 = arith.constant 3.200000e+01 : f32
    %249 = vector.broadcast %cst_110 : f32 to vector<16x1xf32>
    %250 = arith.divf %248, %249 : vector<16x1xf32>
    %251 = vector.broadcast %243 : vector<16x1xf32> to vector<16x32xf32>
    %252 = arith.subf %235, %251 : vector<16x32xf32>
    %cst_111 = arith.constant 9.99999996E-13 : f32
    %253 = vector.broadcast %cst_111 : f32 to vector<16x1xf32>
    %254 = arith.addf %250, %253 : vector<16x1xf32>
    %255 = math.rsqrt %254 : vector<16x1xf32>
    %256 = vector.broadcast %255 : vector<16x1xf32> to vector<16x32xf32>
    %257 = arith.mulf %252, %256 : vector<16x32xf32>
    %258 = vector.broadcast %237 : vector<1x32xf32> to vector<16x32xf32>
    %259 = arith.mulf %257, %258 : vector<16x32xf32>
    %260 = vector.broadcast %239 : vector<1x32xf32> to vector<16x32xf32>
    %261 = arith.addf %259, %260 : vector<16x32xf32>
    %c1_112 = arith.constant 1 : index
    %c0_113 = arith.constant 0 : index
    %c0_114 = arith.constant 0 : index
    %262 = vector.load %arg10[%c1_112, %c0_113, %c0_114] : memref<2x32x64xf32, #tpu.memory_space<vmem>>, vector<1x32x64xf32>
    %263 = vector.shape_cast %262 : vector<1x32x64xf32> to vector<32x64xf32>
    %cst_115 = arith.constant dense<0.000000e+00> : vector<16x64xf32>
    %264 = tpu.matmul %261, %263, %cst_115 {dimension_numbers = #tpu.dot_dimension_numbers<[1], [0], [0], [1], [0, 0, 1, 1], [], []>} : vector<16x32xf32>, vector<32x64xf32>, vector<16x64xf32> -> vector<16x64xf32>
    %c1_116 = arith.constant 1 : index
    %c0_117 = arith.constant 0 : index
    %c0_118 = arith.constant 0 : index
    %265 = vector.load %arg11[%c1_116, %c0_117, %c0_118] : memref<2x1x64xf32, #tpu.memory_space<vmem>>, vector<1x1x64xf32>
    %266 = vector.shape_cast %265 : vector<1x1x64xf32> to vector<1x64xf32>
    %267 = vector.broadcast %266 : vector<1x64xf32> to vector<16x64xf32>
    %268 = arith.addf %264, %267 : vector<16x64xf32>
    %269 = arith.mulf %268, %268 : vector<16x64xf32>
    %270 = arith.mulf %268, %269 : vector<16x64xf32>
    %cst_119 = arith.constant 4.471500e-02 : f32
    %271 = vector.broadcast %cst_119 : f32 to vector<16x64xf32>
    %272 = arith.mulf %271, %270 : vector<16x64xf32>
    %273 = arith.addf %268, %272 : vector<16x64xf32>
    %cst_120 = arith.constant 0.797884583 : f32
    %274 = vector.broadcast %cst_120 : f32 to vector<16x64xf32>
    %275 = arith.mulf %274, %273 : vector<16x64xf32>
    %276 = math.tanh %275 : vector<16x64xf32>
    %cst_121 = arith.constant 1.000000e+00 : f32
    %277 = vector.broadcast %cst_121 : f32 to vector<16x64xf32>
    %278 = arith.addf %277, %276 : vector<16x64xf32>
    %cst_122 = arith.constant 5.000000e-01 : f32
    %279 = vector.broadcast %cst_122 : f32 to vector<16x64xf32>
    %280 = arith.mulf %279, %278 : vector<16x64xf32>
    %281 = arith.mulf %268, %280 : vector<16x64xf32>
    %c1_123 = arith.constant 1 : index
    %c0_124 = arith.constant 0 : index
    %c0_125 = arith.constant 0 : index
    %282 = vector.load %arg12[%c1_123, %c0_124, %c0_125] : memref<2x64x32xf32, #tpu.memory_space<vmem>>, vector<1x64x32xf32>
    %283 = vector.shape_cast %282 : vector<1x64x32xf32> to vector<64x32xf32>
    %cst_126 = arith.constant dense<0.000000e+00> : vector<16x32xf32>
    %284 = tpu.matmul %281, %283, %cst_126 {dimension_numbers = #tpu.dot_dimension_numbers<[1], [0], [0], [1], [0, 0, 1, 1], [], []>} : vector<16x64xf32>, vector<64x32xf32>, vector<16x32xf32> -> vector<16x32xf32>
    %c1_127 = arith.constant 1 : index
    %c0_128 = arith.constant 0 : index
    %c0_129 = arith.constant 0 : index
    %285 = vector.load %arg13[%c1_127, %c0_128, %c0_129] : memref<2x1x32xf32, #tpu.memory_space<vmem>>, vector<1x1x32xf32>
    %286 = vector.shape_cast %285 : vector<1x1x32xf32> to vector<1x32xf32>
    %287 = vector.broadcast %286 : vector<1x32xf32> to vector<16x32xf32>
    %288 = arith.addf %284, %287 : vector<16x32xf32>
    %289 = arith.addf %288, %261 : vector<16x32xf32>
    %c1_130 = arith.constant 1 : index
    %c0_131 = arith.constant 0 : index
    %c0_132 = arith.constant 0 : index
    %290 = vector.load %arg14[%c1_130, %c0_131, %c0_132] : memref<2x1x32xf32, #tpu.memory_space<vmem>>, vector<1x1x32xf32>
    %291 = vector.shape_cast %290 : vector<1x1x32xf32> to vector<1x32xf32>
    %c1_133 = arith.constant 1 : index
    %c0_134 = arith.constant 0 : index
    %c0_135 = arith.constant 0 : index
    %292 = vector.load %arg15[%c1_133, %c0_134, %c0_135] : memref<2x1x32xf32, #tpu.memory_space<vmem>>, vector<1x1x32xf32>
    %293 = vector.shape_cast %292 : vector<1x1x32xf32> to vector<1x32xf32>
    %cst_136 = arith.constant dense<0.000000e+00> : vector<16xf32>
    %294 = vector.multi_reduction <add>, %289, %cst_136 [1] : vector<16x32xf32> to vector<16xf32>
    %295 = vector.shape_cast %294 : vector<16xf32> to vector<16x1xf32>
    %cst_137 = arith.constant 3.200000e+01 : f32
    %296 = vector.broadcast %cst_137 : f32 to vector<16x1xf32>
    %297 = arith.divf %295, %296 : vector<16x1xf32>
    %298 = vector.broadcast %297 : vector<16x1xf32> to vector<16x32xf32>
    %299 = arith.subf %289, %298 : vector<16x32xf32>
    %300 = arith.mulf %299, %299 : vector<16x32xf32>
    %cst_138 = arith.constant dense<0.000000e+00> : vector<16xf32>
    %301 = vector.multi_reduction <add>, %300, %cst_138 [1] : vector<16x32xf32> to vector<16xf32>
    %302 = vector.shape_cast %301 : vector<16xf32> to vector<16x1xf32>
    %cst_139 = arith.constant 3.200000e+01 : f32
    %303 = vector.broadcast %cst_139 : f32 to vector<16x1xf32>
    %304 = arith.divf %302, %303 : vector<16x1xf32>
    %305 = vector.broadcast %297 : vector<16x1xf32> to vector<16x32xf32>
    %306 = arith.subf %289, %305 : vector<16x32xf32>
    %cst_140 = arith.constant 9.99999996E-13 : f32
    %307 = vector.broadcast %cst_140 : f32 to vector<16x1xf32>
    %308 = arith.addf %304, %307 : vector<16x1xf32>
    %309 = math.rsqrt %308 : vector<16x1xf32>
    %310 = vector.broadcast %309 : vector<16x1xf32> to vector<16x32xf32>
    %311 = arith.mulf %306, %310 : vector<16x32xf32>
    %312 = vector.broadcast %291 : vector<1x32xf32> to vector<16x32xf32>
    %313 = arith.mulf %311, %312 : vector<16x32xf32>
    %314 = vector.broadcast %293 : vector<1x32xf32> to vector<16x32xf32>
    %315 = arith.addf %313, %314 : vector<16x32xf32>
    %c0_141 = arith.constant 0 : index
    %c0_142 = arith.constant 0 : index
    %316 = vector.load %arg16[%c0_141, %c0_142] : memref<16x32xf32, #tpu.memory_space<vmem>>, vector<16x32xf32>
    tpu.vector_store %arg16[%c0_141, %c0_142], %315 {strides = array<i32>} : memref<16x32xf32, #tpu.memory_space<vmem>>, vector<16x32xf32>,
    return
  }
}

</mosaic_0001>

<bundles_post_ra>
// kernel: text_encoder_forward.1
= control target key start
LH: loop header
LB: loop body
LE: loop exit
PB: predicated region body
PF: predicated region fallthrough
CT: control target
= control target key end

     0   :  { %vm57_vm0 = vcmask 261120   ;;  %v1484_v2 = vmov 32.0   ;;  %s1486_s24 = smov 96   ;;  %s1487_s25 = smov 80   ;;  %vm165_vm8 = vcmask 130048   ;;  %vm227_vm9 = vcmask 64512   ;;  %s1933_s0 = inlined_call_operand.vmem [shape: f32[16,32], index: 0, kind: input, shape index: {}]   ;;  %s1934_s2 = inlined_call_operand.vmem [shape: f32[1,32], index: 2, kind: input, shape index: {}]   ;;  %s1935_s3 = inlined_call_operand.vmem [shape: f32[1,32], index: 3, kind: input, shape index: {}]   ;;  %s1936_s5 = inlined_call_operand.vmem [shape: f32[2,1,96], index: 5, kind: input, shape index: {}]   ;;  %s1937_s4 = inlined_call_operand.vmem [shape: f32[2,32,96], index: 4, kind: input, shape index: {}]   ;;  %s1938_s1 = inlined_call_operand.vmem [shape: f32[2,1,8], index: 1, kind: input, shape index: {}]   ;;  %s1939_s6 = inlined_call_operand.vmem [shape: f32[2,32,32], index: 6, kind: input, shape index: {}]   ;;  %s1940_s7 = inlined_call_operand.vmem [shape: f32[2,1,32], index: 7, kind: input, shape index: {}]   ;;  %s1941_s8 = inlined_call_operand.vmem [shape: f32[2,1,32], index: 8, kind: input, shape index: {}]   ;;  %s1942_s9 = inlined_call_operand.vmem [shape: f32[2,1,32], index: 9, kind: input, shape index: {}]   ;;  %s1943_s11 = inlined_call_operand.vmem [shape: f32[2,1,64], index: 11, kind: input, shape index: {}]   ;;  %s1944_s10 = inlined_call_operand.vmem [shape: f32[2,32,64], index: 10, kind: input, shape index: {}]   ;;  %s1945_s13 = inlined_call_operand.vmem [shape: f32[2,1,32], index: 13, kind: input, shape index: {}]   ;;  %s1946_s12 = inlined_call_operand.vmem [shape: f32[2,64,32], index: 12, kind: input, shape index: {}]   ;;  %s1947_s14 = inlined_call_operand.vmem [shape: f32[2,1,32], index: 14, kind: input, shape index: {}]   ;;  %s1948_s15 = inlined_call_operand.vmem [shape: f32[2,1,32], index: 15, kind: input, shape index: {}]   ;;  %s1949_s16 = inlined_call_operand.vmem [shape: f32[16,32], index: 16, kind: output, shape index: {}]  }
   0x1   :  { %1951 = sst [smem:[#allocation2_spill]] %s1933_s0  ;;  %1422 = vrcp.f32 %v1484_v2  ;;  %v124_v16 = vld [vmem:[%s1937_s4 + $0x18] sm:$0xff]  ;;  %v123_v17 = vld [vmem:[%s1937_s4 + $0x10] sm:$0xff]  ;;  %v122_v18 = vld [vmem:[%s1937_s4 + $0x8] sm:$0xff]  ;;  %s1488_s28 = smov 112  }
   0x2   :  { %s1952_s23 = sld [smem:[#allocation2_spill]]  ;;  %147 = vmatpush.msra.mxu0 %v124_v16  ;;  %v121_v19 = vld [vmem:[%s1937_s4] sm:$0xff] }
   0x3   :  { %v1402_v34 = vld [vmem:[%s1934_s2] ss:$0 sm:$0xff] }
   0x4   :  { %148 = vmatpush.msra.mxu0 %v123_v17  ;;  %v1403_v37 = vld [vmem:[%s1935_s3] ss:$0 sm:$0xff]  ;;  %s1485_s3 = smov 64  }
   0x5   :  { %v1404_v47 = vld [vmem:[%s1936_s5] ss:$0 sm:$0xff] }
   0x6   :  { %149 = vmatpush.msra.mxu0 %v122_v18  ;;  %v1639_v61 = vld [vmem:[%s1938_s1] ss:$0 sm:$0xff] }
   0x7   :  { %v1423_v5 = vpop.eup %1422 }
   0x8   :  { %v53_v0 = vld [vmem:[%s1952_s23] sm:$0xff]  ;;  %v54_v3 = vld [vmem:[%s1952_s23 + $0x8] sm:$0xff]  ;;  %v65_v6 = vmul.f32 32.0, %v1423_v5  ;;  %vm69_vm1 = vweird.f32 %v1423_v5  ;;  %150 = vmatpush.msra.mxu0 %v121_v19 }
   0x9   :  { %v58_v1 = vsel %vm57_vm0, %v53_v0, 0.0  ;;  %v61_v4 = vsel %vm57_vm0, %v54_v3, 0.0 }
   0xa   :  { %59 = vadd.xlane.f32.xlu0 %v58_v1  ;;  %62 = vadd.xlane.f32.xlu1 %v61_v4  ;;  %v66_v7 = vsub.f32 1.0, %v65_v6 }
   0xc   :  { %v67_v8 = vmul.f32 %v1423_v5, %v66_v7 }
   0xe   :  { %v68_v9 = vadd.f32 %v1423_v5, %v67_v8 }
  0x10   :  { %v1583_v10 = vsel %vm69_vm1, %v1423_v5, %v68_v9  ;;  %v159_v9 = vld [vmem:[%s1939_s6 + $0x8] sm:$0xff]  ;;  %vm625_vm1 = vcmask 523264  }
  0x11   :  { %485 = vmatpush.msrb.mxu0 %v159_v9 }
  0x7d   :  { %v60_v11 = vpop.xlane.xlu0 %59  ;;  %v63_v20 = vpop.xlane.xlu1 %62 }
  0x7e   :  { %v71_v12 = vmul.f32 %v1583_v10, %v60_v11  ;;  %v72_v21 = vmul.f32 %v1583_v10, %v63_v20 }
  0x80   :  { %v73_v13 = vsub.f32 %v53_v0, %v71_v12  ;;  %v74_v23 = vsub.f32 %v54_v3, %v72_v21  ;;  %v158_v21 = vld [vmem:[%s1939_s6] sm:$0xff] }
  0x81   :  { %486 = vmatpush.msrb.mxu0 %v158_v21 }
  0x82   :  { %v75_v14 = vmul.f32 %v73_v13, %v73_v13  ;;  %v76_v25 = vmul.f32 %v74_v23, %v74_v23 }
  0x84   :  { %v77_v15 = vsel %vm57_vm0, %v75_v14, 0.0  ;;  %v80_v27 = vsel %vm57_vm0, %v76_v25, 0.0  ;;  %v1661_v14 = vld [vmem:[%s1938_s1 + $0x1] ss:$0 sm:$0xff]  ;;  %s1489_s1 = smov 48  }
  0x85   :  { %78 = vadd.xlane.f32.xlu0 %v77_v15  ;;  %81 = vadd.xlane.f32.xlu2 %v80_v27 }
  0xf8   :  { %v79_v22 = vpop.xlane.xlu0 %78  ;;  %v82_v40 = vpop.xlane.xlu2 %81 }
  0xf9   :  { %v83_v24 = vmul.f32 %v79_v22, %v1583_v10  ;;  %v84_v41 = vmul.f32 %v82_v40, %v1583_v10 }
  0xfb   :  { %v85_v26 = vadd.f32 1e-12, %v83_v24  ;;  %v86_v42 = vadd.f32 1e-12, %v84_v41 }
  0xfd   :  { %1424 = vrsqrt.f32 %v85_v26  ;;  %vm93_vm3 = vweird.f32 %v85_v26  ;;  %vm103_vm5 = vweird.f32 %v86_v42 }
  0xfe   :  { %1426 = vrsqrt.f32 %v86_v42 }
 0x103   :  { %v1425_v28 = vpop.eup %1424 }
 0x104   :  { %v88_v29 = vmul.f32 %v1425_v28, %v85_v26  ;;  %vm94_vm2 = vweird.f32 %v1425_v28  ;;  %v1427_v43 = vpop.eup %1426 }
 0x105   :  { %vm95_vm4 = vmor %vm93_vm3, %vm94_vm2  ;;  %v98_v44 = vmul.f32 %v1427_v43, %v86_v42  ;;  %vm104_vm6 = vweird.f32 %v1427_v43 }
 0x106   :  { %v89_v30 = vmul.f32 %v1425_v28, %v88_v29  ;;  %vm105_vm7 = vmor %vm103_vm5, %vm104_vm6 }
 0x107   :  { %v99_v45 = vmul.f32 %v1427_v43, %v98_v44 }
 0x108   :  { %v90_v31 = vmul.f32 0.5, %v89_v30 }
 0x109   :  { %v100_v46 = vmul.f32 0.5, %v99_v45 }
 0x10a   :  { %v91_v32 = vsub.f32 1.5, %v90_v31 }
 0x10b   :  { %v101_v48 = vsub.f32 1.5, %v100_v46 }
 0x10c   :  { %v92_v33 = vmul.f32 %v1425_v28, %v91_v32 }
 0x10d   :  { %v102_v49 = vmul.f32 %v1427_v43, %v101_v48 }
 0x10e   :  { %v96_v35 = vsel %vm95_vm4, %v1425_v28, %v92_v33 }
 0x10f   :  { %v107_v36 = vmul.f32 %v96_v35, %v73_v13  ;;  %v106_v52 = vsel %vm105_vm7, %v1427_v43, %v102_v49 }
 0x110   :  { %v108_v53 = vmul.f32 %v106_v52, %v74_v23 }
 0x111   :  { %v112_v38 = vmul.f32 %v1402_v34, %v107_v36 }
 0x112   :  { %v113_v54 = vmul.f32 %v1402_v34, %v108_v53  ;;  %v161_v53 = vld [vmem:[%s1939_s6 + $0x18] sm:$0xff] }
 0x113   :  { %v1608_v39 = vadd.f32 %v1403_v37, %v112_v38 }
 0x114   :  { %v1622_v55 = vadd.f32 %v1403_v37, %v113_v54 }
 0x115   :  { %1314 = vmatmul.msk.f32.vlgmr.msra.gmra.mxu0 %vm57_vm0, %v1608_v39 }
 0x11d   :  { %1315 = vmatmul.msk.f32.gmra.mxu0 %vm57_vm0, %v1622_v55 }
 0x192   :  { %v152_v50 = vpop.f32.mrf.mxu0 }
 0x193   :  { %v1616_v51 = vadd.f32 %v1404_v47, %v152_v50 }
 0x195   :  { %250 = vrot.lane.b32.xlu0 %v1616_v51, %s1485_s3  ;;  %163 = vrot.lane.b32.xlu1 %v1616_v51, %s1486_s24 }
 0x19a   :  { %v155_v59 = vpop.f32.mrf.mxu0 }
 0x19b   :  { %v1632_v60 = vadd.f32 %v1404_v47, %v155_v59 }
 0x19d   :  { %304 = vrot.lane.b32.xlu1 %v1616_v51, %s1487_s25 }
 0x1a5   :  { %332 = vrot.lane.b32.xlu1 %v1632_v60, %s1487_s25 }
 0x207   :  { %v251_v56 = vpop.permute.xlu0 %250  ;;  %v164_v57 = vpop.permute.xlu1 %163 }
 0x208   :  { %1316 = vmatpush.xpose.msk.msra.mxu1 %vm165_vm8, %v164_v57 }
 0x20b   :  { %1317 = vmatmul.msk.f32.vlgmr.msra.gmra.mxu1 %vm165_vm8, %v1616_v51 }
 0x20c   :  { %271 = vmatpush.msrb.mxu1 %v251_v56 }
 0x20f   :  { %v305_v58 = vpop.permute.xlu1 %304 }
 0x210   :  { %1322 = vmatpush.xpose.msk.msra.mxu1 %vm165_vm8, %v305_v58 }
 0x217   :  { %v333_v6 = vpop.permute.xlu1 %332 }
 0x288   :  { %v187_v62 = vpop.f32.mrf.mxu1 }
 0x289   :  { %v217_v63 = vmul.f32 0.25, %v187_v62 }
 0x28b   :  { %v225_v0 = vadd.f32 %v1639_v61, %v217_v63 }
 0x28d   :  { %v228_v1 = vsel %vm227_vm9, %v225_v0, -inf }
 0x28e   :  { %229 = vmax.xlane.f32.xlu2 %v228_v1 }
 0x2a6   :  { %191 = vrot.lane.b32.xlu2 %v1632_v60, %s1486_s24 }
 0x2ae   :  { %302 = vrot.lane.b32.xlu2 %v1616_v51, %s1488_s28 }
 0x301   :  { %v230_v2 = vpop.xlane.xlu2 %229 }
 0x302   :  { %v234_v3 = vsub.f32 %v225_v0, %v230_v2  ;;  %v1407_v2 = vld [vmem:[%s1940_s7] ss:$0 sm:$0xff] }
 0x304   :  { %v236_v4 = vmul.f32 1.442695, %v234_v3 }
 0x306   :  { %1428 = vpow2.f32 %v236_v4 }
 0x309   :  { %v192_v5 = vpop.permute.xlu2 %191 }
 0x30a   :  { %1318 = vmatpush.xpose.msk.msra.mxu2 %vm165_vm8, %v192_v5 }
 0x30c   :  { %v1429_v7 = vpop.eup %1428 }
 0x30d   :  { %1319 = vmatmul.msk.f32.vlgmr.msra.gmra.mxu2 %vm165_vm8, %v1632_v60  ;;  %v240_v8 = vsel %vm227_vm9, %v1429_v7, 0.0 }
 0x30e   :  { %1324 = vmatpush.xpose.msk.msrb.mxu2 %vm165_vm8, %v333_v6  ;;  %241 = vadd.xlane.f32.xlu0 %v240_v8 }
 0x311   :  { %v303_v17 = vpop.permute.xlu2 %302 }
 0x312   :  { %456 = vmatpush.msra.mxu2 %v161_v53 }
 0x322   :  { %330 = vrot.lane.b32.xlu0 %v1632_v60, %s1488_s28 }
 0x381   :  { %v242_v11 = vpop.xlane.xlu0 %241 }
 0x382   :  { %1430 = vrcp.f32 %v242_v11 }
 0x388   :  { %v1431_v12 = vpop.eup %1430 }
 0x389   :  { %v248_v13 = vmul.f32 %v1431_v12, %v1429_v7 }
 0x38b   :  { %1320 = vmatmul.msk.f32.vlgmr.msrb.gmra.mxu1 %vm227_vm9, %v248_v13 }
 0x390   :  { %v214_v15 = vpop.f32.mrf.mxu2 }
 0x391   :  { %v218_v16 = vmul.f32 0.25, %v214_v15 }
 0x393   :  { %1323 = vmatmul.msk.f32.vlgmr.msra.gmra.mxu1 %vm165_vm8, %v303_v17  ;;  %v226_v18 = vadd.f32 %v1661_v14, %v218_v16 }
 0x394   :  { %v331_v19 = vpop.permute.xlu0 %330 }
 0x395   :  { %1325 = vmatmul.msk.f32.vlgmr.msrb.gmra.mxu2 %vm165_vm8, %v331_v19  ;;  %v231_v20 = vsel %vm227_vm9, %v226_v18, -inf }
 0x396   :  { %232 = vmax.xlane.f32.xlu2 %v231_v20 }
 0x408   :  { %v273_v22 = vpop.f32.mrf.mxu1 }
 0x409   :  { %1330 = vmatmul.msk.f32.vlgmr.msrb.gmra.mxu0 %vm165_vm8, %v273_v22  ;;  %v233_v23 = vpop.xlane.xlu2 %232 }
 0x40a   :  { %v235_v24 = vsub.f32 %v226_v18, %v233_v23 }
 0x40c   :  { %v238_v25 = vmul.f32 1.442695, %v235_v24 }
 0x40e   :  { %1432 = vpow2.f32 %v238_v25 }
 0x410   :  { %v327_v26 = vpop.f32.mrf.mxu1 }
 0x411   :  { %v358_v27 = vmul.f32 0.25, %v327_v26  ;;  %v560_v26 = vld [vmem:[%s1944_s10 + $0x10] sm:$0xff] }
 0x413   :  { %v360_v28 = vadd.f32 %v1639_v61, %v358_v27  ;;  %v559_v27 = vld [vmem:[%s1944_s10 + $0x8] sm:$0xff] }
 0x414   :  { %v1433_v29 = vpop.eup %1432 }
 0x415   :  { %v243_v30 = vsel %vm227_vm9, %v1433_v29, 0.0  ;;  %v362_v31 = vsel %vm227_vm9, %v360_v28, -inf }
 0x416   :  { %244 = vadd.xlane.f32.xlu2 %v243_v30  ;;  %363 = vmax.xlane.f32.xlu1 %v362_v31 }
 0x418   :  { %v355_v32 = vpop.f32.mrf.mxu2 }
 0x419   :  { %v359_v33 = vmul.f32 0.25, %v355_v32 }
 0x41b   :  { %v361_v34 = vadd.f32 %v1661_v14, %v359_v33 }
 0x41d   :  { %v365_v35 = vsel %vm227_vm9, %v361_v34, -inf }
 0x41e   :  { %366 = vmax.xlane.f32.xlu0 %v365_v35 }
 0x42e   :  { %384 = vrot.lane.b32.xlu2 %v1616_v51, %s1489_s1 }
 0x432   :  { %276 = vrot.lane.b32.xlu0 %v1632_v60, %s1485_s3 }
 0x486   :  { %v488_v3 = vpop.f32.mrf.mxu0 }
 0x489   :  { %v364_v36 = vpop.xlane.xlu1 %363  ;;  %v245_v42 = vpop.xlane.xlu2 %244 }
 0x48a   :  { %v368_v40 = vsub.f32 %v360_v28, %v364_v36  ;;  %v558_v28 = vld [vmem:[%s1944_s10] sm:$0xff] }
 0x48c   :  { %v370_v43 = vmul.f32 1.442695, %v368_v40 }
 0x491   :  { %v367_v37 = vpop.xlane.xlu0 %366  ;;  %v385_v51 = vpop.permute.xlu2 %384 }
 0x492   :  { %v369_v38 = vsub.f32 %v361_v34, %v367_v37 }
 0x494   :  { %v372_v41 = vmul.f32 1.442695, %v369_v38 }
 0x496   :  { %1434 = vpow2.f32 %v372_v41 }
 0x497   :  { %1436 = vrcp.f32 %v245_v42 }
 0x498   :  { %1438 = vpow2.f32 %v370_v43  ;;  %v1408_v43 = vld [vmem:[%s1941_s8] ss:$0 sm:$0xff] }
 0x49c   :  { %v1435_v44 = vpop.eup %1434 }
 0x49d   :  { %v377_v45 = vsel %vm227_vm9, %v1435_v44, 0.0  ;;  %v1437_v46 = vpop.eup %1436 }
 0x49e   :  { %378 = vadd.xlane.f32.xlu1 %v377_v45  ;;  %v1439_v47 = vpop.eup %1438  ;;  %v249_v49 = vmul.f32 %v1437_v46, %v1433_v29 }
 0x49f   :  { %v374_v50 = vsel %vm227_vm9, %v1439_v47, 0.0 }
 0x4a4   :  { %v277_v48 = vpop.permute.xlu0 %276 }
 0x4a5   :  { %297 = vmatpush.msra.mxu3 %v277_v48 }
 0x4a6   :  { %1321 = vmatmul.msk.f32.vlgmr.msra.gmra.mxu3 %vm227_vm9, %v249_v49  ;;  %375 = vadd.xlane.f32.xlu1 %v374_v50 }
 0x4a7   :  { %405 = vmatpush.msrb.mxu3 %v385_v51 }
 0x4bf   :  { %410 = vrot.lane.b32.xlu1 %v1632_v60, %s1489_s1  ;;  %v160_v60 = vld [vmem:[%s1939_s6 + $0x10] sm:$0xff] }
 0x4c0   :  { %457 = vmatpush.msra.mxu2 %v160_v60  ;;  %v617_v60 = vld [vmem:[%s1946_s12 + $0x20] sm:$0xff] }
 0x511   :  { %v379_v52 = vpop.xlane.xlu1 %378 }
 0x519   :  { %v376_v54 = vpop.xlane.xlu1 %375 }
 0x51a   :  { %1440 = vrcp.f32 %v376_v54 }
 0x51b   :  { %1442 = vrcp.f32 %v379_v52 }
 0x520   :  { %v1441_v56 = vpop.eup %1440 }
 0x521   :  { %v382_v57 = vmul.f32 %v1441_v56, %v1439_v47  ;;  %v1443_v59 = vpop.eup %1442  ;;  %v1409_v47 = vld [vmem:[%s1942_s9] ss:$0 sm:$0xff] }
 0x522   :  { %v383_v62 = vmul.f32 %v1443_v59, %v1435_v44  ;;  %v620_v59 = vld [vmem:[%s1946_s12 + $0x38] sm:$0xff] }
 0x523   :  { %1326 = vmatmul.msk.f32.vlgmr.msrb.gmra.mxu3 %vm227_vm9, %v382_v57 }
 0x529   :  { %v299_v58 = vpop.f32.mrf.mxu3 }
 0x52a   :  { %1331 = vmatmul.msk.f32.gmra.mxu0 %vm165_vm8, %v299_v58 }
 0x531   :  { %v411_v63 = vpop.permute.xlu1 %410 }
 0x532   :  { %431 = vmatpush.msrb.mxu1 %v411_v63  ;;  %v618_v63 = vld [vmem:[%s1946_s12 + $0x28] sm:$0xff] }
 0x533   :  { %1327 = vmatmul.msk.f32.vlgmr.msrb.gmra.mxu1 %vm227_vm9, %v383_v62  ;;  %v619_v62 = vld [vmem:[%s1946_s12 + $0x30] sm:$0xff] }
 0x534   :  { %640 = vmatpush.msra.mxu1 %v620_v59 }
 0x536   :  { %641 = vmatpush.msra.mxu1 %v619_v62 }
 0x538   :  { %642 = vmatpush.msra.mxu1 %v618_v63 }
 0x53a   :  { %643 = vmatpush.msra.mxu1 %v617_v60 }
 0x5a6   :  { %v407_v0 = vpop.f32.mrf.mxu3 }
 0x5a7   :  { %1328 = vmatmul.msk.f32.vlgmr.msra.gmra.mxu2 %vm165_vm8, %v407_v0  ;;  %v491_v9 = vpop.f32.mrf.mxu0  ;;  %v616_v0 = vld [vmem:[%s1946_s12 + $0x18] sm:$0xff] }
 0x5a8   :  { %644 = vmatpush.msra.mxu1 %v616_v0 }
 0x5b0   :  { %v433_v1 = vpop.f32.mrf.mxu1 }
 0x5b1   :  { %1329 = vmatmul.msk.f32.gmra.mxu2 %vm165_vm8, %v433_v1  ;;  %v615_v1 = vld [vmem:[%s1946_s12 + $0x10] sm:$0xff] }
 0x5b2   :  { %645 = vmatpush.msra.mxu1 %v615_v1 }
 0x62a   :  { %v459_v4 = vpop.f32.mrf.mxu2 }
 0x62b   :  { %v489_v5 = vadd.f32 %v488_v3, %v459_v4  ;;  %v613_v3 = vld [vmem:[%s1946_s12] sm:$0xff] }
 0x62c   :  { %v1410_v4 = vld [vmem:[%s1943_s11] ss:$0 sm:$0xff] }
 0x62d   :  { %v498_v6 = vadd.f32 %v1407_v2, %v489_v5 }
 0x62f   :  { %v500_v7 = vadd.f32 %v498_v6, %v1608_v39 }
 0x631   :  { %v504_v8 = vsel %vm57_vm0, %v500_v7, 0.0 }
 0x632   :  { %505 = vadd.xlane.f32.xlu0 %v504_v8 }
 0x634   :  { %v462_v11 = vpop.f32.mrf.mxu2 }
 0x635   :  { %v492_v12 = vadd.f32 %v491_v9, %v462_v11 }
 0x637   :  { %v499_v13 = vadd.f32 %v1407_v2, %v492_v12  ;;  %v614_v2 = vld [vmem:[%s1946_s12 + $0x8] sm:$0xff] }
 0x638   :  { %646 = vmatpush.msra.mxu1 %v614_v2  ;;  %v1412_v2 = vld [vmem:[%s1947_s14] ss:$0 sm:$0xff] }
 0x639   :  { %v501_v15 = vadd.f32 %v499_v13, %v1622_v55  ;;  %v561_v55 = vld [vmem:[%s1944_s10 + $0x18] sm:$0xff] }
 0x63a   :  { %584 = vmatpush.msra.mxu3 %v561_v55  ;;  %647 = vmatpush.msra.mxu1 %v613_v3 }
 0x63b   :  { %v507_v16 = vsel %vm57_vm0, %v501_v15, 0.0 }
 0x63c   :  { %508 = vadd.xlane.f32.xlu2 %v507_v16  ;;  %585 = vmatpush.msra.mxu3 %v560_v26 }
 0x63e   :  { %586 = vmatpush.msra.mxu3 %v559_v27  ;;  %v1411_v27 = vld [vmem:[%s1945_s13] ss:$0 sm:$0xff] }
 0x640   :  { %587 = vmatpush.msra.mxu3 %v558_v28 }
 0x6a5   :  { %v506_v17 = vpop.xlane.xlu0 %505 }
 0x6a6   :  { %v510_v18 = vmul.f32 %v506_v17, %v1583_v10 }
 0x6a8   :  { %v512_v19 = vsub.f32 %v500_v7, %v510_v18 }
 0x6aa   :  { %v514_v20 = vmul.f32 %v512_v19, %v512_v19 }
 0x6ac   :  { %v516_v21 = vsel %vm57_vm0, %v514_v20, 0.0 }
 0x6ad   :  { %517 = vadd.xlane.f32.xlu1 %v516_v21 }
 0x6af   :  { %v509_v39 = vpop.xlane.xlu2 %508 }
 0x6b0   :  { %v511_v22 = vmul.f32 %v509_v39, %v1583_v10 }
 0x6b2   :  { %v513_v23 = vsub.f32 %v501_v15, %v511_v22 }
 0x6b4   :  { %v515_v24 = vmul.f32 %v513_v23, %v513_v23 }
 0x6b6   :  { %v519_v25 = vsel %vm57_vm0, %v515_v24, 0.0 }
 0x6b7   :  { %520 = vadd.xlane.f32.xlu0 %v519_v25 }
 0x720   :  { %v518_v29 = vpop.xlane.xlu1 %517 }
 0x721   :  { %v522_v30 = vmul.f32 %v518_v29, %v1583_v10 }
 0x723   :  { %v524_v31 = vadd.f32 1e-12, %v522_v30 }
 0x725   :  { %1444 = vrsqrt.f32 %v524_v31  ;;  %vm532_vm11 = vweird.f32 %v524_v31 }
 0x72a   :  { %v521_v32 = vpop.xlane.xlu0 %520 }
 0x72b   :  { %v1445_v33 = vpop.eup %1444  ;;  %v523_v34 = vmul.f32 %v521_v32, %v1583_v10 }
 0x72c   :  { %v527_v35 = vmul.f32 %v1445_v33, %v524_v31  ;;  %vm533_vm10 = vweird.f32 %v1445_v33 }
 0x72d   :  { %v525_v36 = vadd.f32 1e-12, %v523_v34  ;;  %vm534_vm12 = vmor %vm532_vm11, %vm533_vm10 }
 0x72e   :  { %v528_v37 = vmul.f32 %v1445_v33, %v527_v35 }
 0x72f   :  { %1446 = vrsqrt.f32 %v525_v36  ;;  %vm542_vm14 = vweird.f32 %v525_v36 }
 0x730   :  { %v529_v38 = vmul.f32 0.5, %v528_v37 }
 0x732   :  { %v530_v40 = vsub.f32 1.5, %v529_v38 }
 0x734   :  { %v531_v41 = vmul.f32 %v1445_v33, %v530_v40 }
 0x735   :  { %v1447_v42 = vpop.eup %1446 }
 0x736   :  { %v535_v44 = vsel %vm534_vm12, %v1445_v33, %v531_v41  ;;  %v537_v45 = vmul.f32 %v1447_v42, %v525_v36  ;;  %vm543_vm13 = vweird.f32 %v1447_v42 }
 0x737   :  { %v546_v46 = vmul.f32 %v535_v44, %v512_v19  ;;  %vm544_vm15 = vmor %vm542_vm14, %vm543_vm13 }
 0x738   :  { %v538_v48 = vmul.f32 %v1447_v42, %v537_v45 }
 0x739   :  { %v551_v49 = vmul.f32 %v1408_v43, %v546_v46 }
 0x73a   :  { %v539_v50 = vmul.f32 0.5, %v538_v48  ;;  %v1338_v48 = vld [vmem:[%s1937_s4 + $0x30] sm:$0xff] }
 0x73b   :  { %v556_v51 = vadd.f32 %v1409_v47, %v551_v49  ;;  %v1337_v49 = vld [vmem:[%s1937_s4 + $0x28] sm:$0xff] }
 0x73c   :  { %v540_v52 = vsub.f32 1.5, %v539_v50  ;;  %v1336_v50 = vld [vmem:[%s1937_s4 + $0x20] sm:$0xff] }
 0x73d   :  { %1332 = vmatmul.msk.f32.vlgmr.msra.gmra.mxu3 %vm57_vm0, %v556_v51 }
 0x73e   :  { %v541_v53 = vmul.f32 %v1447_v42, %v540_v52 }
 0x740   :  { %v545_v54 = vsel %vm544_vm15, %v1447_v42, %v541_v53 }
 0x741   :  { %v547_v56 = vmul.f32 %v545_v54, %v513_v23 }
 0x743   :  { %v552_v57 = vmul.f32 %v1408_v43, %v547_v56 }
 0x745   :  { %v557_v58 = vadd.f32 %v1409_v47, %v552_v57  ;;  %v1339_v47 = vld [vmem:[%s1937_s4 + $0x38] sm:$0xff] }
 0x746   :  { %741 = vmatpush.msrb.mxu2 %v1339_v47 }
 0x747   :  { %1333 = vmatmul.msk.f32.gmra.mxu3 %vm57_vm0, %v557_v58 }
 0x748   :  { %742 = vmatpush.msrb.mxu2 %v1338_v48 }
 0x74a   :  { %743 = vmatpush.msrb.mxu2 %v1337_v49 }
 0x74c   :  { %744 = vmatpush.msrb.mxu2 %v1336_v50 }
 0x7c0   :  { %v589_v5 = vpop.f32.mrf.mxu3 }
 0x7c1   :  { %v590_v6 = vadd.f32 %v1410_v4, %v589_v5 }
 0x7c3   :  { %v595_v7 = vmul.f32 %v590_v6, %v590_v6 }
 0x7c5   :  { %v597_v8 = vmul.f32 %v595_v7, %v590_v6 }
 0x7c7   :  { %v599_v9 = vmul.f32 0.044715, %v597_v8 }
 0x7c9   :  { %v601_v11 = vadd.f32 %v599_v9, %v590_v6 }
 0x7ca   :  { %v592_v12 = vpop.f32.mrf.mxu3 }
 0x7cb   :  { %v603_v13 = vmul.f32 0.7978846, %v601_v11  ;;  %v593_v15 = vadd.f32 %v1410_v4, %v592_v12 }
 0x7cd   :  { %1448 = vtanh.f32 %v603_v13  ;;  %v596_v16 = vmul.f32 %v593_v15, %v593_v15 }
 0x7cf   :  { %v598_v17 = vmul.f32 %v596_v16, %v593_v15 }
 0x7d1   :  { %v600_v18 = vmul.f32 0.044715, %v598_v17 }
 0x7d3   :  { %v1449_v19 = vpop.eup %1448  ;;  %v602_v20 = vadd.f32 %v600_v18, %v593_v15 }
 0x7d4   :  { %v607_v21 = vadd.f32 1.0, %v1449_v19  ;;  %v1414_v19 = vld [vmem:[%s1936_s5 + $0x1] ss:$0 sm:$0xff] }
 0x7d5   :  { %v604_v39 = vmul.f32 0.7978846, %v602_v20 }
 0x7d6   :  { %v609_v22 = vmul.f32 0.5, %v607_v21 }
 0x7d7   :  { %1450 = vtanh.f32 %v604_v39 }
 0x7d8   :  { %v611_v23 = vmul.f32 %v609_v22, %v590_v6  ;;  %v1413_v6 = vld [vmem:[%s1948_s15] ss:$0 sm:$0xff] }
 0x7da   :  { %1334 = vmatmul.msk.f32.vlgmr.msra.gmra.mxu1 %vm625_vm1, %v611_v23 }
 0x7dd   :  { %v1451_v24 = vpop.eup %1450 }
 0x7de   :  { %v608_v25 = vadd.f32 1.0, %v1451_v24 }
 0x7e0   :  { %v610_v55 = vmul.f32 0.5, %v608_v25 }
 0x7e2   :  { %v612_v26 = vmul.f32 %v610_v55, %v593_v15 }
 0x7e4   :  { %1335 = vmatmul.msk.f32.gmra.mxu1 %vm625_vm1, %v612_v26 }
 0x857   :  { %v649_v28 = vpop.f32.mrf.mxu1 }
 0x858   :  { %v650_v29 = vadd.f32 %v1411_v27, %v649_v28 }
 0x85a   :  { %v655_v30 = vadd.f32 %v650_v29, %v556_v51 }
 0x85c   :  { %v659_v31 = vsel %vm57_vm0, %v655_v30, 0.0 }
 0x85d   :  { %660 = vadd.xlane.f32.xlu2 %v659_v31 }
 0x861   :  { %v652_v32 = vpop.f32.mrf.mxu1 }
 0x862   :  { %v653_v33 = vadd.f32 %v1411_v27, %v652_v32 }
 0x864   :  { %v656_v34 = vadd.f32 %v653_v33, %v557_v58 }
 0x866   :  { %v662_v35 = vsel %vm57_vm0, %v656_v34, 0.0 }
 0x867   :  { %663 = vadd.xlane.f32.xlu0 %v662_v35 }
 0x8d0   :  { %v661_v36 = vpop.xlane.xlu2 %660 }
 0x8d1   :  { %v665_v37 = vmul.f32 %v661_v36, %v1583_v10 }
 0x8d3   :  { %v667_v38 = vsub.f32 %v655_v30, %v665_v37 }
 0x8d5   :  { %v669_v40 = vmul.f32 %v667_v38, %v667_v38 }
 0x8d7   :  { %v671_v41 = vsel %vm57_vm0, %v669_v40, 0.0 }
 0x8d8   :  { %672 = vadd.xlane.f32.xlu2 %v671_v41 }
 0x8da   :  { %v664_v42 = vpop.xlane.xlu0 %663 }
 0x8db   :  { %v666_v43 = vmul.f32 %v664_v42, %v1583_v10 }
 0x8dd   :  { %v668_v44 = vsub.f32 %v656_v34, %v666_v43 }
 0x8df   :  { %v670_v45 = vmul.f32 %v668_v44, %v668_v44 }
 0x8e1   :  { %v674_v46 = vsel %vm57_vm0, %v670_v45, 0.0 }
 0x8e2   :  { %675 = vadd.xlane.f32.xlu0 %v674_v46 }
 0x94b   :  { %v673_v51 = vpop.xlane.xlu2 %672 }
 0x94c   :  { %v677_v52 = vmul.f32 %v673_v51, %v1583_v10 }
 0x94e   :  { %v679_v53 = vadd.f32 1e-12, %v677_v52 }
 0x950   :  { %1452 = vrsqrt.f32 %v679_v53  ;;  %vm687_vm3 = vweird.f32 %v679_v53 }
 0x955   :  { %v676_v54 = vpop.xlane.xlu0 %675 }
 0x956   :  { %v1453_v56 = vpop.eup %1452  ;;  %v678_v57 = vmul.f32 %v676_v54, %v1583_v10 }
 0x957   :  { %v682_v58 = vmul.f32 %v1453_v56, %v679_v53  ;;  %vm688_vm2 = vweird.f32 %v1453_v56 }
 0x958   :  { %v680_v59 = vadd.f32 1e-12, %v678_v57  ;;  %vm689_vm4 = vmor %vm687_vm3, %vm688_vm2 }
 0x959   :  { %v683_v62 = vmul.f32 %v1453_v56, %v682_v58 }
 0x95a   :  { %1454 = vrsqrt.f32 %v680_v59  ;;  %vm697_vm6 = vweird.f32 %v680_v59 }
 0x95b   :  { %v684_v63 = vmul.f32 0.5, %v683_v62 }
 0x95d   :  { %v685_v60 = vsub.f32 1.5, %v684_v63 }
 0x95f   :  { %v686_v0 = vmul.f32 %v1453_v56, %v685_v60 }
 0x960   :  { %v1455_v1 = vpop.eup %1454 }
 0x961   :  { %v690_v3 = vsel %vm689_vm4, %v1453_v56, %v686_v0  ;;  %v692_v4 = vmul.f32 %v1455_v1, %v680_v59  ;;  %vm698_vm5 = vweird.f32 %v1455_v1 }
 0x962   :  { %v701_v5 = vmul.f32 %v690_v3, %v667_v38  ;;  %vm699_vm7 = vmor %vm697_vm6, %vm698_vm5 }
 0x963   :  { %v693_v7 = vmul.f32 %v1455_v1, %v692_v4 }
 0x964   :  { %v706_v8 = vmul.f32 %v1412_v2, %v701_v5 }
 0x965   :  { %v694_v9 = vmul.f32 0.5, %v693_v7 }
 0x966   :  { %v1787_v11 = vadd.f32 %v1413_v6, %v706_v8  ;;  %v1344_v8 = vld [vmem:[%s1939_s6 + $0x28] sm:$0xff] }
 0x967   :  { %v695_v12 = vsub.f32 1.5, %v694_v9 }
 0x968   :  { %1341 = vmatmul.msk.f32.vlgmr.msrb.gmra.mxu2 %vm57_vm0, %v1787_v11 }
 0x969   :  { %v696_v13 = vmul.f32 %v1455_v1, %v695_v12 }
 0x96b   :  { %v700_v15 = vsel %vm699_vm7, %v1455_v1, %v696_v13 }
 0x96c   :  { %v702_v16 = vmul.f32 %v700_v15, %v668_v44 }
 0x96e   :  { %v707_v17 = vmul.f32 %v1412_v2, %v702_v16 }
 0x970   :  { %v1791_v18 = vadd.f32 %v1413_v6, %v707_v17 }
 0x972   :  { %1342 = vmatmul.msk.f32.gmra.mxu2 %vm57_vm0, %v1791_v18 }
 0x9eb   :  { %v746_v20 = vpop.f32.mrf.mxu2 }
 0x9ec   :  { %v747_v21 = vadd.f32 %v1414_v19, %v746_v20 }
 0x9ee   :  { %758 = vrot.lane.b32.xlu2 %v747_v21, %s1486_s24 }
 0x9f5   :  { %v749_v39 = vpop.f32.mrf.mxu2 }
 0x9f6   :  { %v750_v22 = vadd.f32 %v1414_v19, %v749_v39  ;;  %889 = vrot.lane.b32.xlu2 %v747_v21, %s1488_s28 }
 0x9f8   :  { %919 = vrot.lane.b32.xlu0 %v750_v22, %s1487_s25  ;;  %785 = vrot.lane.b32.xlu1 %v750_v22, %s1486_s24  ;;  %v1392_v50 = vpack.i.bf16 %v750_v22, %v747_v21 }
 0xa00   :  { %917 = vrot.lane.b32.xlu1 %v750_v22, %s1488_s28  ;;  %891 = vrot.lane.b32.xlu0 %v747_v21, %s1487_s25 }
 0xa48   :  { %v759_v23 = vpop.permute.xlu2 %758 }
 0xa49   :  { %1347 = vmatpush.xpose.msk.msra.mxu0 %vm165_vm8, %v759_v23 }
 0xa4c   :  { %1348 = vmatmul.msk.f32.vlgmr.msra.gmra.mxu0 %vm165_vm8, %v747_v21 }
 0xa50   :  { %v890_v27 = vpop.permute.xlu2 %889 }
 0xa6a   :  { %v920_v24 = vpop.permute.xlu0 %919  ;;  %v786_v25 = vpop.permute.xlu1 %785 }
 0xa6b   :  { %1349 = vmatpush.xpose.msk.msrb.mxu3 %vm165_vm8, %v786_v25  ;;  %1355 = vmatpush.xpose.msk.msra.mxu2 %vm165_vm8, %v920_v24  ;;  %v1343_v24 = vld [vmem:[%s1939_s6 + $0x20] sm:$0xff] }
 0xa6e   :  { %1350 = vmatmul.msk.f32.vlgmr.msrb.gmra.mxu3 %vm165_vm8, %v750_v22 }
 0xa6f   :  { %1072 = vmatpush.msrb.mxu2 %v1344_v8 }
 0xa71   :  { %1073 = vmatpush.msrb.mxu2 %v1343_v24  ;;  %v1379_v24 = vld [vmem:[%s1946_s12 + $0x70] sm:$0xff] }
 0xa72   :  { %v918_v55 = vpop.permute.xlu1 %917  ;;  %v892_v26 = vpop.permute.xlu0 %891 }
 0xa73   :  { %1353 = vmatpush.xpose.msk.msrb.mxu1 %vm165_vm8, %v892_v26  ;;  %1356 = vmatmul.msk.f32.vlgmr.msra.gmra.mxu2 %vm165_vm8, %v918_v55  ;;  %v1346_v55 = vld [vmem:[%s1939_s6 + $0x38] sm:$0xff]  ;;  %v1345_v26 = vld [vmem:[%s1939_s6 + $0x30] sm:$0xff] }
 0xa76   :  { %1354 = vmatmul.msk.f32.vlgmr.msrb.gmra.mxu1 %vm165_vm8, %v890_v27 }
 0xa77   :  { %1043 = vmatpush.msra.mxu1 %v1346_v55  ;;  %v1377_v55 = vld [vmem:[%s1946_s12 + $0x60] sm:$0xff] }
 0xa79   :  { %1044 = vmatpush.msra.mxu1 %v1345_v26  ;;  %v1376_v26 = vld [vmem:[%s1946_s12 + $0x58] sm:$0xff] }
 0xac9   :  { %v781_v28 = vpop.f32.mrf.mxu0 }
 0xaca   :  { %v811_v29 = vmul.f32 0.25, %v781_v28 }
 0xacc   :  { %v813_v30 = vadd.f32 %v1639_v61, %v811_v29 }
 0xace   :  { %v815_v31 = vsel %vm227_vm9, %v813_v30, -inf }
 0xacf   :  { %816 = vmax.xlane.f32.xlu1 %v815_v31 }
 0xaf1   :  { %v808_v32 = vpop.f32.mrf.mxu3 }
 0xaf2   :  { %v812_v33 = vmul.f32 0.25, %v808_v32 }
 0xaf3   :  { %v914_v34 = vpop.f32.mrf.mxu1 }
 0xaf4   :  { %v945_v35 = vmul.f32 0.25, %v914_v34  ;;  %v814_v36 = vadd.f32 %v1661_v14, %v812_v33 }
 0xaf6   :  { %v942_v37 = vpop.f32.mrf.mxu2  ;;  %v818_v38 = vsel %vm227_vm9, %v814_v36, -inf  ;;  %v947_v40 = vadd.f32 %v1639_v61, %v945_v35 }
 0xaf7   :  { %v946_v41 = vmul.f32 0.25, %v942_v37  ;;  %819 = vmax.xlane.f32.xlu0 %v818_v38 }
 0xaf8   :  { %v949_v42 = vsel %vm227_vm9, %v947_v40, -inf }
 0xaf9   :  { %950 = vmax.xlane.f32.xlu2 %v949_v42  ;;  %v948_v43 = vadd.f32 %v1661_v14, %v946_v41 }
 0xafb   :  { %v952_v44 = vsel %vm227_vm9, %v948_v43, -inf }
 0xafc   :  { %953 = vmax.xlane.f32.xlu1 %v952_v44 }
 0xb42   :  { %v817_v45 = vpop.xlane.xlu1 %816 }
 0xb43   :  { %v821_v46 = vsub.f32 %v813_v30, %v817_v45  ;;  %v1415_v30 = vld [vmem:[%s1940_s7 + $0x1] ss:$0 sm:$0xff] }
 0xb45   :  { %v823_v47 = vmul.f32 1.442695, %v821_v46 }
 0xb47   :  { %1456 = vpow2.f32 %v823_v47 }
 0xb4d   :  { %v1457_v48 = vpop.eup %1456 }
 0xb4e   :  { %v827_v49 = vsel %vm227_vm9, %v1457_v48, 0.0 }
 0xb4f   :  { %828 = vadd.xlane.f32.xlu0 %v827_v49 }
 0xb63   :  { %1393 = vrot.lane.b32.xlu0 %v1392_v50, %s1485_s3 }
 0xb6a   :  { %v820_v61 = vpop.xlane.xlu0 %819 }
 0xb6b   :  { %v822_v51 = vsub.f32 %v814_v36, %v820_v61 }
 0xb6c   :  { %v951_v52 = vpop.xlane.xlu2 %950 }
 0xb6d   :  { %v825_v53 = vmul.f32 1.442695, %v822_v51  ;;  %v955_v54 = vsub.f32 %v947_v40, %v951_v52  ;;  %v1368_v52 = vld [vmem:[%s1944_s10 + $0x30] sm:$0xff] }
 0xb6f   :  { %1458 = vpow2.f32 %v825_v53  ;;  %v957_v14 = vmul.f32 1.442695, %v955_v54  ;;  %v954_v56 = vpop.xlane.xlu1 %953  ;;  %v1367_v53 = vld [vmem:[%s1944_s10 + $0x28] sm:$0xff]  ;;  %v1366_v54 = vld [vmem:[%s1944_s10 + $0x20] sm:$0xff] }
 0xb70   :  { %v956_v57 = vsub.f32 %v948_v43, %v954_v56 }
 0xb71   :  { %1460 = vpow2.f32 %v957_v14 }
 0xb72   :  { %v959_v58 = vmul.f32 1.442695, %v956_v57 }
 0xb74   :  { %1462 = vpow2.f32 %v959_v58 }
 0xb75   :  { %v1459_v59 = vpop.eup %1458 }
 0xb76   :  { %v830_v62 = vsel %vm227_vm9, %v1459_v59, 0.0 }
 0xb77   :  { %v1461_v63 = vpop.eup %1460  ;;  %831 = vadd.xlane.f32.xlu2 %v830_v62 }
 0xb78   :  { %v961_v60 = vsel %vm227_vm9, %v1461_v63, 0.0 }
 0xb79   :  { %962 = vadd.xlane.f32.xlu1 %v961_v60 }
 0xb7a   :  { %v1463_v0 = vpop.eup %1462 }
 0xb7b   :  { %v964_v1 = vsel %vm227_vm9, %v1463_v0, 0.0 }
 0xb7f   :  { %965 = vadd.xlane.f32.xlu2 %v964_v1 }
 0xb92   :  { %1398 = vrot.lane.b32.xlu1 %v1392_v50, %s1489_s1 }
 0xbc2   :  { %v829_v2 = vpop.xlane.xlu0 %828 }
 0xbc3   :  { %1464 = vrcp.f32 %v829_v2 }
 0xbc9   :  { %v1465_v3 = vpop.eup %1464 }
 0xbca   :  { %v835_v7 = vmul.f32 %v1465_v3, %v1457_v48 }
 0xbd5   :  { %v1394_v4 = vpop.permute.xlu0 %1393 }
 0xbd6   :  { %v1396_v5 = vunpack.i.h.bf16 %v1394_v4  ;;  %v1395_v6 = vunpack.i.l.bf16 %v1394_v4 }
 0xbd8   :  { %858 = vmatpush.msrb.mxu0 %v1395_v6  ;;  %884 = vmatpush.msra.mxu3 %v1396_v5  ;;  %v1416_v6 = vld [vmem:[%s1941_s8 + $0x1] ss:$0 sm:$0xff] }
 0xbd9   :  { %1351 = vmatmul.msk.f32.vlgmr.msrb.gmra.mxu0 %vm227_vm9, %v835_v7 }
 0xbea   :  { %v832_v9 = vpop.xlane.xlu2 %831 }
 0xbeb   :  { %1466 = vrcp.f32 %v832_v9 }
 0xbec   :  { %v963_v15 = vpop.xlane.xlu1 %962 }
 0xbed   :  { %1468 = vrcp.f32 %v963_v15 }
 0xbf1   :  { %v1467_v12 = vpop.eup %1466 }
 0xbf2   :  { %v836_v13 = vmul.f32 %v1467_v12, %v1459_v59  ;;  %v966_v16 = vpop.xlane.xlu2 %965  ;;  %v1417_v12 = vld [vmem:[%s1942_s9 + $0x1] ss:$0 sm:$0xff] }
 0xbf3   :  { %1470 = vrcp.f32 %v966_v16  ;;  %v1469_v17 = vpop.eup %1468 }
 0xbf4   :  { %1352 = vmatmul.msk.f32.vlgmr.msra.gmra.mxu3 %vm227_vm9, %v836_v13  ;;  %v969_v22 = vmul.f32 %v1469_v17, %v1461_v63 }
 0xbf9   :  { %v1471_v19 = vpop.eup %1470 }
 0xbfa   :  { %v970_v23 = vmul.f32 %v1471_v19, %v1463_v0 }
 0xc04   :  { %v1399_v20 = vpop.permute.xlu1 %1398 }
 0xc05   :  { %v1401_v21 = vunpack.i.h.bf16 %v1399_v20  ;;  %v1400_v39 = vunpack.i.l.bf16 %v1399_v20 }
 0xc07   :  { %992 = vmatpush.msra.mxu0 %v1400_v39  ;;  %1018 = vmatpush.msrb.mxu3 %v1401_v21 }
 0xc08   :  { %1357 = vmatmul.msk.f32.vlgmr.msra.gmra.mxu0 %vm227_vm9, %v969_v22  ;;  %1358 = vmatmul.msk.f32.vlgmr.msrb.gmra.mxu3 %vm227_vm9, %v970_v23  ;;  %v1380_v23 = vld [vmem:[%s1946_s12 + $0x78] sm:$0xff] }
 0xc09   :  { %1233 = vmatpush.msra.mxu3 %v1380_v23 }
 0xc0b   :  { %1234 = vmatpush.msra.mxu3 %v1379_v24  ;;  %v1420_v24 = vld [vmem:[%s1947_s14 + $0x1] ss:$0 sm:$0xff] }
 0xc56   :  { %v860_v25 = vpop.f32.mrf.mxu0 }
 0xc57   :  { %1361 = vmatmul.msk.f32.vlgmr.msrb.gmra.mxu2 %vm165_vm8, %v860_v25  ;;  %v1378_v25 = vld [vmem:[%s1946_s12 + $0x68] sm:$0xff] }
 0xc58   :  { %1235 = vmatpush.msra.mxu3 %v1378_v25 }
 0xc5a   :  { %1236 = vmatpush.msra.mxu3 %v1377_v55 }
 0xc5c   :  { %1237 = vmatpush.msra.mxu3 %v1376_v26 }
 0xc77   :  { %v886_v27 = vpop.f32.mrf.mxu3 }
 0xc78   :  { %1362 = vmatmul.msk.f32.gmra.mxu2 %vm165_vm8, %v886_v27  ;;  %v1375_v27 = vld [vmem:[%s1946_s12 + $0x50] sm:$0xff] }
 0xc79   :  { %1238 = vmatpush.msra.mxu3 %v1375_v27 }
 0xc85   :  { %v994_v28 = vpop.f32.mrf.mxu0 }
 0xc86   :  { %1359 = vmatmul.msk.f32.vlgmr.msra.gmra.mxu1 %vm165_vm8, %v994_v28  ;;  %v1374_v28 = vld [vmem:[%s1946_s12 + $0x48] sm:$0xff] }
 0xc87   :  { %1239 = vmatpush.msra.mxu3 %v1374_v28 }
 0xc8b   :  { %v1020_v29 = vpop.f32.mrf.mxu3 }
 0xc8e   :  { %1360 = vmatmul.msk.f32.gmra.mxu1 %vm165_vm8, %v1020_v29  ;;  %v1373_v29 = vld [vmem:[%s1946_s12 + $0x40] sm:$0xff] }
 0xc8f   :  { %1240 = vmatpush.msra.mxu3 %v1373_v29 }
 0xcda   :  { %v1075_v31 = vpop.f32.mrf.mxu2 }
 0xcfb   :  { %v1078_v37 = vpop.f32.mrf.mxu2 }
 0xd03   :  { %v1046_v32 = vpop.f32.mrf.mxu1 }
 0xd04   :  { %v1076_v33 = vadd.f32 %v1075_v31, %v1046_v32 }
 0xd06   :  { %v1086_v34 = vadd.f32 %v1415_v30, %v1076_v33 }
 0xd08   :  { %v1088_v35 = vadd.f32 %v1086_v34, %v1787_v11 }
 0xd0a   :  { %v1094_v36 = vsel %vm57_vm0, %v1088_v35, 0.0 }
 0xd0b   :  { %1095 = vadd.xlane.f32.xlu2 %v1094_v36  ;;  %v1049_v38 = vpop.f32.mrf.mxu1 }
 0xd0c   :  { %v1079_v40 = vadd.f32 %v1078_v37, %v1049_v38 }
 0xd0e   :  { %v1087_v41 = vadd.f32 %v1415_v30, %v1079_v40  ;;  %v1418_v30 = vld [vmem:[%s1943_s11 + $0x1] ss:$0 sm:$0xff] }
 0xd10   :  { %v1089_v42 = vadd.f32 %v1087_v41, %v1791_v18  ;;  %v1369_v18 = vld [vmem:[%s1944_s10 + $0x38] sm:$0xff] }
 0xd11   :  { %1176 = vmatpush.msrb.mxu0 %v1369_v18  ;;  %v1419_v18 = vld [vmem:[%s1945_s13 + $0x1] ss:$0 sm:$0xff] }
 0xd12   :  { %v1097_v43 = vsel %vm57_vm0, %v1089_v42, 0.0 }
 0xd13   :  { %1098 = vadd.xlane.f32.xlu2 %v1097_v43  ;;  %1177 = vmatpush.msrb.mxu0 %v1368_v52 }
 0xd15   :  { %1178 = vmatpush.msrb.mxu0 %v1367_v53 }
 0xd17   :  { %1179 = vmatpush.msrb.mxu0 %v1366_v54 }
 0xd7e   :  { %v1096_v44 = vpop.xlane.xlu2 %1095 }
 0xd7f   :  { %v1100_v45 = vmul.f32 %v1096_v44, %v1583_v10 }
 0xd81   :  { %v1102_v46 = vsub.f32 %v1088_v35, %v1100_v45 }
 0xd83   :  { %v1104_v47 = vmul.f32 %v1102_v46, %v1102_v46 }
 0xd85   :  { %v1106_v48 = vsel %vm57_vm0, %v1104_v47, 0.0 }
 0xd86   :  { %1107 = vadd.xlane.f32.xlu0 %v1106_v48  ;;  %v1099_v11 = vpop.xlane.xlu2 %1098 }
 0xd87   :  { %v1101_v49 = vmul.f32 %v1099_v11, %v1583_v10 }
 0xd89   :  { %v1103_v50 = vsub.f32 %v1089_v42, %v1101_v49 }
 0xd8b   :  { %v1105_v61 = vmul.f32 %v1103_v50, %v1103_v50 }
 0xd8d   :  { %v1109_v51 = vsel %vm57_vm0, %v1105_v61, 0.0 }
 0xd8e   :  { %1110 = vadd.xlane.f32.xlu2 %v1109_v51 }
 0xdf9   :  { %v1108_v14 = vpop.xlane.xlu0 %1107 }
 0xdfa   :  { %v1112_v56 = vmul.f32 %v1108_v14, %v1583_v10 }
 0xdfc   :  { %v1114_v57 = vadd.f32 1e-12, %v1112_v56 }
 0xdfe   :  { %1472 = vrsqrt.f32 %v1114_v57  ;;  %vm1122_vm9 = vweird.f32 %v1114_v57 }
 0xe01   :  { %v1111_v58 = vpop.xlane.xlu2 %1110 }
 0xe02   :  { %v1113_v59 = vmul.f32 %v1111_v58, %v1583_v10 }
 0xe04   :  { %v1473_v62 = vpop.eup %1472  ;;  %v1115_v63 = vadd.f32 1e-12, %v1113_v59 }
 0xe05   :  { %v1117_v60 = vmul.f32 %v1473_v62, %v1114_v57  ;;  %vm1123_vm8 = vweird.f32 %v1473_v62 }
 0xe06   :  { %1474 = vrsqrt.f32 %v1115_v63  ;;  %vm1124_vm10 = vmor %vm1122_vm9, %vm1123_vm8  ;;  %vm1132_vm12 = vweird.f32 %v1115_v63 }
 0xe07   :  { %v1118_v0 = vmul.f32 %v1473_v62, %v1117_v60 }
 0xe09   :  { %v1119_v1 = vmul.f32 0.5, %v1118_v0 }
 0xe0b   :  { %v1120_v2 = vsub.f32 1.5, %v1119_v1 }
 0xe0c   :  { %v1475_v3 = vpop.eup %1474 }
 0xe0d   :  { %v1121_v4 = vmul.f32 %v1473_v62, %v1120_v2  ;;  %v1127_v5 = vmul.f32 %v1475_v3, %v1115_v63  ;;  %vm1133_vm11 = vweird.f32 %v1475_v3 }
 0xe0e   :  { %vm1134_vm13 = vmor %vm1132_vm12, %vm1133_vm11 }
 0xe0f   :  { %v1125_v7 = vsel %vm1124_vm10, %v1473_v62, %v1121_v4  ;;  %v1128_v8 = vmul.f32 %v1475_v3, %v1127_v5 }
 0xe10   :  { %v1136_v9 = vmul.f32 %v1125_v7, %v1102_v46 }
 0xe11   :  { %v1129_v13 = vmul.f32 0.5, %v1128_v8 }
 0xe12   :  { %v1141_v15 = vmul.f32 %v1416_v6, %v1136_v9 }
 0xe13   :  { %v1130_v16 = vsub.f32 1.5, %v1129_v13 }
 0xe14   :  { %v1146_v17 = vadd.f32 %v1417_v12, %v1141_v15 }
 0xe15   :  { %v1131_v19 = vmul.f32 %v1475_v3, %v1130_v16 }
 0xe16   :  { %1371 = vmatmul.msk.f32.vlgmr.msrb.gmra.mxu0 %vm57_vm0, %v1146_v17 }
 0xe17   :  { %v1135_v20 = vsel %vm1134_vm13, %v1475_v3, %v1131_v19 }
 0xe18   :  { %v1137_v21 = vmul.f32 %v1135_v20, %v1103_v50 }
 0xe1a   :  { %v1142_v39 = vmul.f32 %v1416_v6, %v1137_v21 }
 0xe1c   :  { %v1147_v22 = vadd.f32 %v1417_v12, %v1142_v39 }
 0xe1e   :  { %1372 = vmatmul.msk.f32.gmra.mxu0 %vm57_vm0, %v1147_v22 }
 0xe93   :  { %v1181_v31 = vpop.f32.mrf.mxu0 }
 0xe94   :  { %v1182_v32 = vadd.f32 %v1418_v30, %v1181_v31 }
 0xe96   :  { %v1187_v33 = vmul.f32 %v1182_v32, %v1182_v32 }
 0xe98   :  { %v1189_v34 = vmul.f32 %v1187_v33, %v1182_v32 }
 0xe9a   :  { %v1191_v35 = vmul.f32 0.044715, %v1189_v34 }
 0xe9b   :  { %v1184_v36 = vpop.f32.mrf.mxu0 }
 0xe9c   :  { %v1193_v37 = vadd.f32 %v1191_v35, %v1182_v32  ;;  %v1185_v38 = vadd.f32 %v1418_v30, %v1184_v36 }
 0xe9e   :  { %v1195_v40 = vmul.f32 0.7978846, %v1193_v37  ;;  %v1188_v41 = vmul.f32 %v1185_v38, %v1185_v38 }
 0xea0   :  { %1476 = vtanh.f32 %v1195_v40  ;;  %v1190_v42 = vmul.f32 %v1188_v41, %v1185_v38 }
 0xea2   :  { %v1192_v43 = vmul.f32 0.044715, %v1190_v42 }
 0xea4   :  { %v1194_v44 = vadd.f32 %v1192_v43, %v1185_v38 }
 0xea6   :  { %v1477_v45 = vpop.eup %1476  ;;  %v1196_v46 = vmul.f32 0.7978846, %v1194_v44 }
 0xea7   :  { %v1199_v47 = vadd.f32 1.0, %v1477_v45 }
 0xea8   :  { %1478 = vtanh.f32 %v1196_v46 }
 0xea9   :  { %v1201_v48 = vmul.f32 0.5, %v1199_v47 }
 0xeab   :  { %v1203_v11 = vmul.f32 %v1201_v48, %v1182_v32 }
 0xead   :  { %1382 = vmatmul.msk.f32.vlgmr.msra.gmra.mxu3 %vm625_vm1, %v1203_v11 }
 0xeae   :  { %v1479_v49 = vpop.eup %1478 }
 0xeaf   :  { %v1200_v50 = vadd.f32 1.0, %v1479_v49 }
 0xeb1   :  { %v1202_v61 = vmul.f32 0.5, %v1200_v50 }
 0xeb3   :  { %v1204_v51 = vmul.f32 %v1202_v61, %v1185_v38 }
 0xeb5   :  { %1383 = vmatmul.msk.f32.gmra.mxu3 %vm625_vm1, %v1204_v51 }
 0xf30   :  { %v1242_v52 = vpop.f32.mrf.mxu3 }
 0xf31   :  { %v1243_v53 = vadd.f32 %v1419_v18, %v1242_v52 }
 0xf33   :  { %v1248_v54 = vadd.f32 %v1243_v53, %v1146_v17 }
 0xf35   :  { %v1254_v14 = vsel %vm57_vm0, %v1248_v54, 0.0 }
 0xf36   :  { %1255 = vadd.xlane.f32.xlu1 %v1254_v14 }
 0xf38   :  { %v1245_v56 = vpop.f32.mrf.mxu3 }
 0xf39   :  { %v1246_v57 = vadd.f32 %v1419_v18, %v1245_v56 }
 0xf3b   :  { %v1249_v58 = vadd.f32 %v1246_v57, %v1147_v22 }
 0xf3d   :  { %v1257_v59 = vsel %vm57_vm0, %v1249_v58, 0.0 }
 0xf3e   :  { %1258 = vadd.xlane.f32.xlu2 %v1257_v59 }
 0xfa9   :  { %v1256_v62 = vpop.xlane.xlu1 %1255 }
 0xfaa   :  { %v1260_v63 = vmul.f32 %v1256_v62, %v1583_v10 }
 0xfac   :  { %v1262_v60 = vsub.f32 %v1248_v54, %v1260_v63 }
 0xfae   :  { %v1264_v0 = vmul.f32 %v1262_v60, %v1262_v60 }
 0xfb0   :  { %v1266_v1 = vsel %vm57_vm0, %v1264_v0, 0.0 }
 0xfb1   :  { %1267 = vadd.xlane.f32.xlu2 %v1266_v1  ;;  %v1259_v2 = vpop.xlane.xlu2 %1258 }
 0xfb2   :  { %v1261_v3 = vmul.f32 %v1259_v2, %v1583_v10 }
 0xfb4   :  { %v1263_v4 = vsub.f32 %v1249_v58, %v1261_v3 }
 0xfb6   :  { %v1265_v5 = vmul.f32 %v1263_v4, %v1263_v4 }
 0xfb8   :  { %v1269_v6 = vsel %vm57_vm0, %v1265_v5, 0.0 }
 0xfb9   :  { %1270 = vadd.xlane.f32.xlu2 %v1269_v6 }
0x1024   :  { %v1268_v7 = vpop.xlane.xlu2 %1267 }
0x1025   :  { %v1272_v8 = vmul.f32 %v1268_v7, %v1583_v10 }
0x1027   :  { %v1274_v9 = vadd.f32 1e-12, %v1272_v8 }
0x1029   :  { %1480 = vrsqrt.f32 %v1274_v9  ;;  %vm1282_vm15 = vweird.f32 %v1274_v9 }
0x102c   :  { %v1271_v12 = vpop.xlane.xlu2 %1270 }
0x102d   :  { %v1273_v13 = vmul.f32 %v1271_v12, %v1583_v10  ;;  %v1421_v10 = vld [vmem:[%s1948_s15 + $0x1] ss:$0 sm:$0xff] }
0x102f   :  { %v1481_v15 = vpop.eup %1480  ;;  %v1275_v16 = vadd.f32 1e-12, %v1273_v13 }
0x1030   :  { %v1277_v17 = vmul.f32 %v1481_v15, %v1274_v9  ;;  %vm1283_vm14 = vweird.f32 %v1481_v15 }
0x1031   :  { %1482 = vrsqrt.f32 %v1275_v16  ;;  %vm1284_vm1 = vmor %vm1282_vm15, %vm1283_vm14  ;;  %vm1292_vm3 = vweird.f32 %v1275_v16 }
0x1032   :  { %v1278_v19 = vmul.f32 %v1481_v15, %v1277_v17 }
0x1034   :  { %v1279_v20 = vmul.f32 0.5, %v1278_v19 }
0x1036   :  { %v1280_v21 = vsub.f32 1.5, %v1279_v20 }
0x1037   :  { %v1483_v39 = vpop.eup %1482 }
0x1038   :  { %v1281_v22 = vmul.f32 %v1481_v15, %v1280_v21  ;;  %v1287_v23 = vmul.f32 %v1483_v39, %v1275_v16  ;;  %vm1293_vm2 = vweird.f32 %v1483_v39 }
0x1039   :  { %vm1294_vm4 = vmor %vm1292_vm3, %vm1293_vm2 }
0x103a   :  { %v1285_v25 = vsel %vm1284_vm1, %v1481_v15, %v1281_v22  ;;  %v1288_v55 = vmul.f32 %v1483_v39, %v1287_v23 }
0x103b   :  { %v1296_v26 = vmul.f32 %v1285_v25, %v1262_v60 }
0x103c   :  { %v1289_v27 = vmul.f32 0.5, %v1288_v55 }
0x103d   :  { %v1301_v28 = vmul.f32 %v1420_v24, %v1296_v26 }
0x103e   :  { %v1290_v29 = vsub.f32 1.5, %v1289_v27 }
0x103f   :  { %v1306_v30 = vadd.f32 %v1421_v10, %v1301_v28 }
0x1040   :  { %v1291_v31 = vmul.f32 %v1483_v39, %v1290_v29 }
0x1041   :  { %1308 = vst.msk [vmem:[%s1949_s16] sm:$0xff] %vm57_vm0, %v1306_v30 }
0x1042   :  { %v1295_v32 = vsel %vm1294_vm4, %v1483_v39, %v1291_v31 }
0x1043   :  { %v1297_v33 = vmul.f32 %v1295_v32, %v1263_v4 }
0x1045   :  { %v1302_v34 = vmul.f32 %v1420_v24, %v1297_v33 }
0x1047   :  { %v1307_v35 = vadd.f32 %v1421_v10, %v1302_v34 }
0x1049   :  { %1309 = vst.msk [vmem:[%s1949_s16 + $0x8] sm:$0xff] %vm57_vm0, %v1307_v35 }

</bundles_post_ra>
